<compile_context>
chip_gen: v6e
topology: v6e:2x2x1
jax: 0.10.0
libtpu: 0.0.40
codegen_flags: <defaults>
</compile_context>

<pallas_src>
import functools

import numpy as np

import jax
import jax.numpy as jnp
from jax import lax
from jax.experimental import pallas as pl
from jax.experimental.pallas import tpu as pltpu

L = 128          # fixed encoded token width in bytes (lane axis)
TQ_MAX = 512     # query tile cap (lane axis of scores / output)
TV_MAX = 2048    # vocab tile cap (sublane axis of scores)

# Exactness invariants for the squared-distance equality test:
#   bf16/f32 path: byte codes in [-2, 255] are bf16-exact, per-lane products
#     <= 255^2, row sums <= 2*L*255^2 < 2^24 -> exact in the f32 accumulator.
#   int8/int32 path: signed codes in [-128, 127], |2 q.v| <= 2*L*128^2 < 2^31.
assert 2 * L * 255 * 255 < 2 ** 24, "bf16/f32 squared-distance trick not exact"
assert 2 * L * 128 * 128 < 2 ** 31, "int8/int32 squared-distance trick not exact"


def _device_plan():
    """Generation-specific dtype / VMEM plan (per perf review)."""
    try:
        kind = jax.devices()[0].device_kind.lower()
    except Exception:
        kind = ""
    if ("v5" in kind) or ("v6" in kind):
        # v5e/v5p/v6e: int8 MXU path, 128 MiB physical VMEM.
        return {"use_int": True, "vmem_limit": 96 * 1024 * 1024}
    # v7x: no integer MXU, fp8 cannot hold byte codes exactly, 64 MiB VMEM.
    # Unknown generations also take this always-correct bf16/f32 path.
    return {"use_int": False, "vmem_limit": 48 * 1024 * 1024}


def _pad_to(n, m):
    return max(-(-max(n, 1) // m), 1) * m


def _encode_rows(tokens, rows, fill):
    """UTF-8 byte table (rows, L) int32; token rows zero-padded, extra rows
    filled with `fill` (a value outside 0..255 in the unsigned view)."""
    arr = np.full((rows, L), fill, dtype=np.int32)
    n = len(tokens)
    if n:
        arr[:n] = 0
        for i, t in enumerate(tokens):
            # TODO(synk): tokens longer than 128 UTF-8 bytes are truncated; two
            # distinct >128-byte tokens could collide (differs from the dict
            # reference). Raise L or fall back to Python for those tokens.
            b = np.frombuffer(t.encode("utf-8")[:L], dtype=np.uint8)
            arr[i, : b.shape[0]] = b
    return arr


def _tables(tokens, rows, fill, use_int):
    """-> (byte table, per-row squared norms) as device arrays.

    int path : int8 table (two's-complement byte codes), int32 norms.
    bf16 path: bf16 table (unsigned byte codes),          f32  norms.
    Norms are computed in int64 (exact) and cast (values < 2^24, exact).
    """
    raw = _encode_rows(tokens, rows, fill)
    if use_int:
        # Bytes >= 128 map to their two's-complement int8 value; the mapping is
        # a bijection so exact row equality is preserved. Pad fills -1/-2 alias
        # bytes 0xFF/0xFE, which never occur in valid UTF-8, so padded vocab
        # rows can never match a real query row.
        signed = np.where(raw >= 128, raw - 256, raw).astype(np.int64)
        norms = np.einsum("ij,ij->i", signed, signed)
        return (jnp.asarray(signed.astype(np.int8)),
                jnp.asarray(norms.astype(np.int32)))
    wide = raw.astype(np.int64)
    norms = np.einsum("ij,ij->i", wide, wide)
    return (jnp.asarray(raw, dtype=jnp.bfloat16),
            jnp.asarray(norms.astype(np.float32)))


def _vocab_lookup_kernel(default_ref, v_ref, qT_ref, vnorm_ref, qnorm_ref,
                         out_ref, rowid_ref, *, big, use_int):
    """One (query-tile i, vocab-tile k) grid step.

    default_ref: SMEM (1,)      int32       OOV default index (scalar prefetch)
    v_ref:       VMEM (TV, L)   i8/bf16     vocab byte rows, tile k
    qT_ref:      VMEM (L, TQ)   i8/bf16     query bytes, transposed (lane-dense RHS)
    vnorm_ref:   VMEM (TV, 1)   i32/f32     vocab norms (f32 path: ||v||^2 / 2)
    qnorm_ref:   VMEM (1, TQ)   i32/f32     query norms (f32 path: ||q||^2/2 - 0.25)
    out_ref:     VMEM (1, TQ)   int32       running first-match index (resident over k)
    rowid_ref:   VMEM (TV, 1)   int32       scratch: static local row ids
    """
    k = pl.program_id(1)
    n_k = pl.num_programs(1)
    tv = v_ref.shape[0]

    @pl.when(k == 0)
    def _init():
        out_ref[...] = jnp.full(out_ref.shape, big, dtype=jnp.int32)
        # Static local-row iota, built once per query tile (not a fresh
        # [TV, TQ] broadcasted_iota every grid step as in v2).
        rowid_ref[...] = lax.broadcasted_iota(jnp.int32, rowid_ref.shape, 0)

    if use_int:
        scores = jnp.dot(v_ref[...], qT_ref[...],
                         preferred_element_type=jnp.int32)        # [TV, TQ]
        # ||q - v||^2 == 0  <=>  2 q.v == ||v||^2 + ||q||^2  (exact int32)
        match = (scores + scores) == (vnorm_ref[...] + qnorm_ref[...])
    else:
        scores = jnp.dot(v_ref[...], qT_ref[...],
                         preferred_element_type=jnp.float32)      # [TV, TQ]
        # Host folded /2 and the 0.25 threshold into the norms:
        # ||q - v||^2 == 0  <=>  ||v||^2/2 + (||q||^2/2 - 0.25) < q.v
        match = (vnorm_ref[...] + qnorm_ref[...]) < scores

    cand = jnp.where(match, rowid_ref[...], jnp.int32(big))        # [TV, TQ]
    tile_min = jnp.min(cand, axis=0, keepdims=True)                # [1, TQ] sublane reduce (XLU)
    out_ref[...] = jnp.minimum(out_ref[...], tile_min + k * tv)

    @pl.when(k == n_k - 1)
    def _finalize():
        res = out_ref[...]
        out_ref[...] = jnp.where(res < big, res,
                                 default_ref[0]).astype(jnp.int32)


@functools.lru_cache(maxsize=None)
def _build_lookup_fn(Qp, TQ, Vp, TV, use_int, vmem_limit):
    """Cached, jitted pallas_call for a given (padded) problem shape."""
    kernel = functools.partial(_vocab_lookup_kernel, big=Vp, use_int=use_int)
    grid = (Qp // TQ, Vp // TV)   # queries parallel (megacore), vocab innermost
    grid_spec = pltpu.PrefetchScalarGridSpec(
        num_scalar_prefetch=1,
        grid=grid,
        in_specs=[
            pl.BlockSpec((TV, L), lambda i, k, d: (k, 0)),   # vocab bytes
            pl.BlockSpec((L, TQ), lambda i, k, d: (0, i)),   # query bytes (transposed)
            pl.BlockSpec((TV, 1), lambda i, k, d: (k, 0)),   # vocab norms
            pl.BlockSpec((1, TQ), lambda i, k, d: (0, i)),   # query norms
        ],
        out_specs=pl.BlockSpec((1, TQ), lambda i, k, d: (0, i)),   # lane-dense
        scratch_shapes=[pltpu.VMEM((TV, 1), jnp.int32)],
    )
    call = pl.pallas_call(
        kernel,
        out_shape=jax.ShapeDtypeStruct((1, Qp), jnp.int32),
        grid_spec=grid_spec,
        compiler_params=pltpu.CompilerParams(
            dimension_semantics=("parallel", "arbitrary"),
            vmem_limit_bytes=vmem_limit,
        ),
    )
    return jax.jit(call)


class VocabPallas:
    """JAX/Pallas equivalent of the torchtext-style Vocab module.

    `tv_max` / `tq_max` are tiling knobs (defaults tuned per perf review;
    small values are used in tests to exercise the multi-tile paths).
    """

    def __init__(self, tokens, tv_max=TV_MAX, tq_max=TQ_MAX):
        self.tokens = list(tokens)
        self._plan = _device_plan()
        self._tv_max = tv_max
        self._tq_max = tq_max
        self.default_index = 0
        self._build()

    def _build(self):
        # First-occurrence dedup, exactly like Vocab.__build.
        self.itos = []
        self.stoi = {}
        for t in self.tokens:
            if t not in self.stoi:
                self.stoi[t] = len(self.itos)
                self.itos.append(t)
        self.vocab_size = len(self.itos)

        # Vocab tiling: a single tile when it fits (block index then never
        # changes -> fetched once, effectively VMEM-resident), else stream
        # tv_max-row tiles along the innermost "arbitrary" axis.
        if self.vocab_size <= self._tv_max:
            self.Vp = _pad_to(self.vocab_size, 512)
            self.TV = self.Vp
        else:
            self.TV = self._tv_max
            self.Vp = _pad_to(self.vocab_size, self._tv_max)

        use_int = self._plan["use_int"]
        vtab, vnorm = _tables(self.itos, self.Vp, fill=-1, use_int=use_int)
        self.vocab_tab = vtab
        if use_int:
            self.vocab_norm = vnorm.reshape(self.Vp, 1)
        else:
            self.vocab_norm = (vnorm * 0.5).reshape(self.Vp, 1)

    # --- torchtext-style host-side API -------------------------------------
    def set_default_index(self, index):
        self.default_index = index

    def get_default_index(self):
        return self.default_index

    def __len__(self):
        return self.vocab_size

    def __contains__(self, token):
        return token in self.stoi

    def __getitem__(self, token):
        return self.stoi[token]

    def lookup_indices_ref(self, tokens):
        return [self.stoi.get(t, self.default_index) for t in tokens]

    # --- Pallas forward -----------------------------------------------------
    def forward(self, tokens):
        """tokens: list of strings -> int32 array of indices (len(tokens),)."""
        Q = len(tokens)
        # TODO(synk): on v7x, cap TQ at Qp/2 for mid-size batches so both
        # TensorCores get >=1 block on the parallel query axis.
        TQ = min(self._tq_max, _pad_to(Q, 128))
        Qp = _pad_to(Q, TQ)

        use_int = self._plan["use_int"]
        qtab, qnorm = _tables(list(tokens), Qp, fill=-2, use_int=use_int)
        qtab_T = qtab.T                       # (L, Qp): lane-dense matmul RHS
        if use_int:
            qnorm = qnorm.reshape(1, Qp)
        else:
            qnorm = (qnorm * 0.5 - 0.25).reshape(1, Qp)
        default_idx = jnp.asarray([self.default_index], dtype=jnp.int32)

        fn = _build_lookup_fn(Qp, TQ, self.Vp, self.TV, use_int,
                              self._plan["vmem_limit"])
        out = fn(default_idx, self.vocab_tab, qtab_T, self.vocab_norm, qnorm)
        return out[0, :Q]


if __name__ == "__main__":
    # --- Test 1: small vocab, single-tile grid, both default indices --------
    key = jax.random.PRNGKey(0)
    ids = jax.random.randint(key, (12,), 0, 8)
    base_tokens = [f"tok{int(i)}" for i in ids] + ["alpha", "beta", "gamma"]

    vocab = VocabPallas(base_tokens)
    vocab.set_default_index(0)

    queries = [vocab.itos[0], vocab.itos[-1], "unseen_token", vocab.itos[1],
               "another_oov", vocab.itos[2], vocab.itos[0], "zzz"]

    result = jax.block_until_ready(vocab.forward(queries))
    expected = vocab.lookup_indices_ref(queries)
    got = [int(x) for x in list(result)]
    assert got == expected, f"mismatch: kernel={got} expected={expected}"

    vocab.set_default_index(len(vocab) - 1)
    result2 = jax.block_until_ready(vocab.forward(queries))
    expected2 = vocab.lookup_indices_ref(queries)
    got2 = [int(x) for x in list(result2)]
    assert got2 == expected2, f"mismatch: kernel={got2} expected={expected2}"

    # --- Test 2: multi-tile grid (forces small tiles) to exercise the
    #             vocab-reduction accumulator and query-parallel axes ---------
    big_tokens = [f"w{i % 1200}" for i in range(1800)]     # dedup -> 1200 unique
    vocab2 = VocabPallas(big_tokens, tv_max=512, tq_max=128)
    vocab2.set_default_index(7)
    qids = jax.random.randint(jax.random.PRNGKey(1), (300,), 0, 1500)
    queries2 = [f"w{int(i)}" for i in qids]                # ids >= 1200 are OOV
    res2 = jax.block_until_ready(vocab2.forward(queries2))
    exp2 = vocab2.lookup_indices_ref(queries2)
    got2b = [int(x) for x in list(res2)]
    assert got2b == exp2, "multi-tile mismatch"

    print("KERNEL_OK")
</pallas_src>

<mosaic_0001>
module attributes {stable_mosaic.version = 11 : i64} {
  func.func @_vocab_lookup_kernel(%arg0: i32, %arg1: i32, %arg2: memref<1xi32, #tpu.memory_space<smem>>, %arg3: memref<512x128xbf16, #tpu.memory_space<vmem>>, %arg4: memref<128x128xbf16, #tpu.memory_space<vmem>>, %arg5: memref<512x1xf32, #tpu.memory_space<vmem>>, %arg6: memref<1x128xf32, #tpu.memory_space<vmem>>, %arg7: memref<1x128xi32, #tpu.memory_space<vmem>>, %arg8: memref<512x1xi32, #tpu.memory_space<vmem>>) attributes {dimension_semantics = [#tpu.dimension_semantics<parallel>, #tpu.dimension_semantics<arbitrary>], iteration_bounds = array<i64: 1, 1>, scalar_prefetch = 1 : i64, scratch_operands = 1 : i64, tpu.core_type = #tpu.core_type<tc>, window_params = [{transform_indices = @transform_0, window_bounds = array<i64: 512, 128>}, {transform_indices = @transform_1, window_bounds = array<i64: 128, 128>}, {transform_indices = @transform_2, window_bounds = array<i64: 512, 1>}, {transform_indices = @transform_3, window_bounds = array<i64: 1, 128>}, {transform_indices = @transform_4, window_bounds = array<i64: 1, 128>}]} {
    %c0_i32 = arith.constant 0 : i32
    %0 = arith.cmpi eq, %arg1, %c0_i32 : i32
    %1 = arith.extui %0 : i1 to i32
    %c0_i32_0 = arith.constant 0 : i32
    %2 = arith.cmpi ne, %1, %c0_i32_0 : i32
    scf.if %2 {
      %c512_i32_18 = arith.constant 512 : i32
      %28 = vector.broadcast %c512_i32_18 : i32 to vector<1x128xi32>
      %c0_19 = arith.constant 0 : index
      %c0_20 = arith.constant 0 : index
      %29 = vector.load %arg7[%c0_19, %c0_20] : memref<1x128xi32, #tpu.memory_space<vmem>>, vector<1x128xi32>
      tpu.vector_store %arg7[%c0_19, %c0_20], %28 {strides = array<i32>} : memref<1x128xi32, #tpu.memory_space<vmem>>, vector<1x128xi32>,
      %30 = tpu.iota {dimensions = array<i32: 0>} : vector<512x1xi32>
      %c0_21 = arith.constant 0 : index
      %c0_22 = arith.constant 0 : index
      %31 = vector.load %arg8[%c0_21, %c0_22] : memref<512x1xi32, #tpu.memory_space<vmem>>, vector<512x1xi32>
      tpu.vector_store %arg8[%c0_21, %c0_22], %30 {strides = array<i32>} : memref<512x1xi32, #tpu.memory_space<vmem>>, vector<512x1xi32>,
    } else {
    }
    %c0 = arith.constant 0 : index
    %c0_1 = arith.constant 0 : index
    %3 = vector.load %arg3[%c0, %c0_1] : memref<512x128xbf16, #tpu.memory_space<vmem>>, vector<512x128xbf16>
    %c0_2 = arith.constant 0 : index
    %c0_3 = arith.constant 0 : index
    %4 = vector.load %arg4[%c0_2, %c0_3] : memref<128x128xbf16, #tpu.memory_space<vmem>>, vector<128x128xbf16>
    %cst = arith.constant dense<0.000000e+00> : vector<512x128xf32>
    %5 = tpu.matmul %3, %4, %cst {dimension_numbers = #tpu.dot_dimension_numbers<[1], [0], [0], [1], [0, 0, 1, 1], [], []>} : vector<512x128xbf16>, vector<128x128xbf16>, vector<512x128xf32> -> vector<512x128xf32>
    %c0_4 = arith.constant 0 : index
    %c0_5 = arith.constant 0 : index
    %6 = vector.load %arg5[%c0_4, %c0_5] : memref<512x1xf32, #tpu.memory_space<vmem>>, vector<512x1xf32>
    %c0_6 = arith.constant 0 : index
    %c0_7 = arith.constant 0 : index
    %7 = vector.load %arg6[%c0_6, %c0_7] : memref<1x128xf32, #tpu.memory_space<vmem>>, vector<1x128xf32>
    %8 = vector.broadcast %6 : vector<512x1xf32> to vector<512x128xf32>
    %9 = vector.broadcast %7 : vector<1x128xf32> to vector<512x128xf32>
    %10 = arith.addf %8, %9 : vector<512x128xf32>
    %11 = arith.cmpf olt, %10, %5 : vector<512x128xf32>
    %c0_8 = arith.constant 0 : index
    %c0_9 = arith.constant 0 : index
    %12 = vector.load %arg8[%c0_8, %c0_9] : memref<512x1xi32, #tpu.memory_space<vmem>>, vector<512x1xi32>
    %c512_i32 = arith.constant 512 : i32
    %13 = vector.shape_cast %12 : vector<512x1xi32> to vector<512x1xi32>
    %14 = vector.broadcast %13 : vector<512x1xi32> to vector<512x128xi32>
    %15 = vector.broadcast %c512_i32 : i32 to vector<512x128xi32>
    %16 = arith.select %11, %14, %15 : vector<512x128xi1>, vector<512x128xi32>
    %cst_10 = arith.constant dense<2147483647> : vector<128xi32>
    %17 = vector.multi_reduction <minsi>, %16, %cst_10 [0] : vector<512x128xi32> to vector<128xi32>
    %18 = vector.shape_cast %17 : vector<128xi32> to vector<1x128xi32>
    %c0_11 = arith.constant 0 : index
    %c0_12 = arith.constant 0 : index
    %19 = vector.load %arg7[%c0_11, %c0_12] : memref<1x128xi32, #tpu.memory_space<vmem>>, vector<1x128xi32>
    %c512_i32_13 = arith.constant 512 : i32
    %20 = arith.muli %arg1, %c512_i32_13 : i32
    %21 = vector.broadcast %20 : i32 to vector<1x128xi32>
    %22 = arith.addi %18, %21 : vector<1x128xi32>
    %23 = arith.minsi %19, %22 : vector<1x128xi32>
    %c0_14 = arith.constant 0 : index
    %c0_15 = arith.constant 0 : index
    %24 = vector.load %arg7[%c0_14, %c0_15] : memref<1x128xi32, #tpu.memory_space<vmem>>, vector<1x128xi32>
    tpu.vector_store %arg7[%c0_14, %c0_15], %23 {strides = array<i32>} : memref<1x128xi32, #tpu.memory_space<vmem>>, vector<1x128xi32>,
    %c0_i32_16 = arith.constant 0 : i32
    %25 = arith.cmpi eq, %arg1, %c0_i32_16 : i32
    %26 = arith.extui %25 : i1 to i32
    %c0_i32_17 = arith.constant 0 : i32
    %27 = arith.cmpi ne, %26, %c0_i32_17 : i32
    scf.if %27 {
      %c0_18 = arith.constant 0 : index
      %c0_19 = arith.constant 0 : index
      %28 = vector.load %arg7[%c0_18, %c0_19] : memref<1x128xi32, #tpu.memory_space<vmem>>, vector<1x128xi32>
      %c512_i32_20 = arith.constant 512 : i32
      %29 = vector.broadcast %c512_i32_20 : i32 to vector<1x128xi32>
      %30 = arith.cmpi slt, %28, %29 : vector<1x128xi32>
      %c0_21 = arith.constant 0 : index
      %31 = memref.load %arg2[%c0_21] : memref<1xi32, #tpu.memory_space<smem>>
      %32 = vector.broadcast %31 : i32 to vector<1x128xi32>
      %33 = arith.select %30, %28, %32 : vector<1x128xi1>, vector<1x128xi32>
      %c0_22 = arith.constant 0 : index
      %c0_23 = arith.constant 0 : index
      %34 = vector.load %arg7[%c0_22, %c0_23] : memref<1x128xi32, #tpu.memory_space<vmem>>, vector<1x128xi32>
      tpu.vector_store %arg7[%c0_22, %c0_23], %33 {strides = array<i32>} : memref<1x128xi32, #tpu.memory_space<vmem>>, vector<1x128xi32>,
    } else {
    }
    return
  }
  func.func @transform_0(%arg0: i32, %arg1: i32, %arg2: memref<1xi32, #tpu.memory_space<smem>>) -> (i32, i32) {
    %c0_i32 = arith.constant 0 : i32
    %c0_i32_0 = arith.constant 0 : i32
    return %arg1, %c0_i32 : i32, i32
  }
  func.func @transform_1(%arg0: i32, %arg1: i32, %arg2: memref<1xi32, #tpu.memory_space<smem>>) -> (i32, i32) {
    %c0_i32 = arith.constant 0 : i32
    %c0_i32_0 = arith.constant 0 : i32
    return %c0_i32, %arg0 : i32, i32
  }
  func.func @transform_2(%arg0: i32, %arg1: i32, %arg2: memref<1xi32, #tpu.memory_space<smem>>) -> (i32, i32) {
    %c0_i32 = arith.constant 0 : i32
    %c0_i32_0 = arith.constant 0 : i32
    return %arg1, %c0_i32 : i32, i32
  }
  func.func @transform_3(%arg0: i32, %arg1: i32, %arg2: memref<1xi32, #tpu.memory_space<smem>>) -> (i32, i32) {
    %c0_i32 = arith.constant 0 : i32
    %c0_i32_0 = arith.constant 0 : i32
    return %c0_i32, %arg0 : i32, i32
  }
  func.func @transform_4(%arg0: i32, %arg1: i32, %arg2: memref<1xi32, #tpu.memory_space<smem>>) -> (i32, i32) {
    %c0_i32 = arith.constant 0 : i32
    %c0_i32_0 = arith.constant 0 : i32
    return %c0_i32, %arg0 : i32, i32
  }
}

</mosaic_0001>

<bundles_post_ra>
// kernel: tpu_custom_call.1
= control target key start
LH: loop header
LB: loop body
LE: loop exit
PB: predicated region body
PF: predicated region fallthrough
CT: control target
= control target key end

     0   :  { %v26_v2 = vlaneseq  ;;  %v2013_v3 = vmov 0   ;;  %vm91_vm0 = vcmask 7168   ;;  %s2916_s0 = inlined_call_operand.<no memory space> [shape: s32[1], index: 0, kind: input, shape index: {}]   ;;  %s2917_s1 = inlined_call_operand.vmem [shape: bf16[512,128], index: 1, kind: input, shape index: {}]   ;;  %s2918_s2 = inlined_call_operand.vmem [shape: bf16[128,128], index: 2, kind: input, shape index: {}]   ;;  %s2919_s3 = inlined_call_operand.vmem [shape: f32[512,1], index: 3, kind: input, shape index: {}]   ;;  %s2920_s4 = inlined_call_operand.vmem [shape: f32[1,128], index: 4, kind: input, shape index: {}]   ;;  %s2921_s5 = inlined_call_operand.hbm [shape: s32[1,128], index: 5, kind: output, shape index: {}]  }
   0x1   :  { %v767_v0 = vld [vmem:[%s2919_s3 + $0x10] sm:$0xff]  ;;  %v765_v1 = vld [vmem:[%s2919_s3] sm:$0xff]  ;;  %1950 = vset.pattern.permute.xlu1 %v2013_v3  ;;  %1949 = vset.pattern.permute.xlu0 %v2013_v3  ;;  %v1951_v4 = vld [vmem:[%s2918_s2 + $0x38] sm:$0xff]  }
   0x2   :  { %842 = vperm.xlu1 %1950, %v767_v0   ;;  %832 = vperm.xlu0 %1949, %v765_v1   ;;  %v2055_v5 = vshrl.u32 %v26_v2, 7  ;;  %v768_v6 = vld [vmem:[%s2919_s3 + $0x18] sm:$0xff]  ;;  %v766_v7 = vld [vmem:[%s2919_s3 + $0x8] sm:$0xff]  ;;  %v1952_v8 = vld [vmem:[%s2918_s2 + $0x30] sm:$0xff]  }
   0x3   :  { %1850 = vmatprep.subr.bf16.mxu0 %v1951_v4  ;;  %1930 = vmatprep.subr.bf16.mxu1 %v1951_v4  ;;  %v1953_v10 = vld [vmem:[%s2918_s2 + $0x28] sm:$0xff]   ;;  %v769_v16 = vld [vmem:[%s2919_s3 + $0x20] sm:$0xff]  ;;  %v772_v22 = vld [vmem:[%s2919_s3 + $0x38] sm:$0xff] }
   0x4   :  { %1851 = vmatpush3.bf16.msra.mxu0 %v1951_v4  ;;  %1938 = vmatpush3.bf16.msra.mxu1 %v1951_v4  ;;  %92 = vst.msk [vmem:[#allocation2] sm:$0xff] %vm91_vm0, %v2055_v5  ;;  %v28_v9 = vadd.s32 8, %v2055_v5  ;;  %v29_v11 = vadd.s32 16, %v2055_v5  ;;  %v30_v12 = vadd.s32 24, %v2055_v5  ;;  %v770_v13 = vld [vmem:[%s2919_s3 + $0x28] sm:$0xff]  ;;  %v31_v14 = vadd.s32 32, %v2055_v5 }
   0x5   :  { %1852 = vmatprep.subr.bf16.mxu0 %v1952_v8  ;;  %1931 = vmatprep.subr.bf16.mxu1 %v1952_v8  ;;  %v32_v15 = vadd.s32 40, %v2055_v5  ;;  %v33_v17 = vadd.s32 48, %v2055_v5  ;;  %v34_v18 = vadd.s32 56, %v2055_v5  ;;  %v1954_v19 = vld [vmem:[%s2918_s2 + $0x20] sm:$0xff]   ;;  %v35_v20 = vadd.s32 64, %v2055_v5  ;;  %v771_v23 = vld [vmem:[%s2919_s3 + $0x30] sm:$0xff] }
   0x6   :  { %847 = vperm.xlu1 %1950, %v768_v6   ;;  %837 = vperm.xlu0 %1949, %v766_v7   ;;  %93 = vst.msk [vmem:[#allocation2 + $0x8] sm:$0xff] %vm91_vm0, %v28_v9  ;;  %94 = vst.msk [vmem:[#allocation2 + $0x10] sm:$0xff] %vm91_vm0, %v29_v11  ;;  %v36_v21 = vadd.s32 72, %v2055_v5  ;;  %v774_v24 = vld [vmem:[%s2919_s3 + $0x48] sm:$0xff]  ;;  %v773_v25 = vld [vmem:[%s2919_s3 + $0x40] sm:$0xff]  ;;  %v37_v27 = vadd.s32 80, %v2055_v5 }
   0x7   :  { %95 = vst.msk [vmem:[#allocation2 + $0x18] sm:$0xff] %vm91_vm0, %v30_v12  ;;  %96 = vst.msk [vmem:[#allocation2 + $0x20] sm:$0xff] %vm91_vm0, %v31_v14  ;;  %v1955_v26 = vld [vmem:[%s2918_s2 + $0x18] sm:$0xff]   ;;  %v38_v28 = vadd.s32 88, %v2055_v5  ;;  %v1959_v29 = vld [vmem:[%s2917_s1] sm:$0xff]   ;;  %v39_v32 = vadd.s32 96, %v2055_v5 }
   0x8   :  { %1853 = vmatpush3.bf16.msra.mxu0 %v1952_v8  ;;  %1939 = vmatpush3.bf16.msra.mxu1 %v1952_v8  ;;  %97 = vst.msk [vmem:[#allocation2 + $0x28] sm:$0xff] %vm91_vm0, %v32_v15  ;;  %98 = vst.msk [vmem:[#allocation2 + $0x30] sm:$0xff] %vm91_vm0, %v33_v17  ;;  %v1960_v30 = vld [vmem:[%s2917_s1 + $0x80] sm:$0xff]   ;;  %v1956_v31 = vld [vmem:[%s2918_s2 + $0x10] sm:$0xff]   ;;  %v40_v34 = vadd.s32 104, %v2055_v5  ;;  %v41_v37 = vadd.s32 112, %v2055_v5 }
   0x9   :  { %1854 = vmatprep.subr.bf16.mxu0 %v1953_v10  ;;  %1932 = vmatprep.subr.bf16.mxu1 %v1953_v10  ;;  %99 = vst.msk [vmem:[#allocation2 + $0x38] sm:$0xff] %vm91_vm0, %v34_v18  ;;  %100 = vst.msk [vmem:[#allocation2 + $0x40] sm:$0xff] %vm91_vm0, %v35_v20  ;;  %v776_v33 = vld [vmem:[%s2919_s3 + $0x58] sm:$0xff]  ;;  %v775_v35 = vld [vmem:[%s2919_s3 + $0x50] sm:$0xff]  ;;  %v42_v38 = vadd.s32 120, %v2055_v5  ;;  %v43_v42 = vadd.s32 128, %v2055_v5 }
   0xa   :  { %857 = vperm.xlu1 %1950, %v770_v13   ;;  %852 = vperm.xlu0 %1949, %v769_v16   ;;  %101 = vst.msk [vmem:[#allocation2 + $0x48] sm:$0xff] %vm91_vm0, %v36_v21  ;;  %102 = vst.msk [vmem:[#allocation2 + $0x50] sm:$0xff] %vm91_vm0, %v37_v27  ;;  %v1957_v36 = vld [vmem:[%s2918_s2 + $0x8] sm:$0xff]   ;;  %v777_v40 = vld [vmem:[%s2919_s3 + $0x60] sm:$0xff]  ;;  %v44_v44 = vadd.s32 136, %v2055_v5  ;;  %v45_v49 = vadd.s32 144, %v2055_v5 }
   0xb   :  { %103 = vst.msk [vmem:[#allocation2 + $0x58] sm:$0xff] %vm91_vm0, %v38_v28  ;;  %1866 = vmatprep.mubr.bf16.mxu0 %v1959_v29  ;;  %1898 = vmatprep.mubr.bf16.mxu1 %v1960_v30  ;;  %104 = vst.msk [vmem:[#allocation2 + $0x60] sm:$0xff] %vm91_vm0, %v39_v32  ;;  %v778_v39 = vld [vmem:[%s2919_s3 + $0x68] sm:$0xff]  ;;  %v1958_v41 = vld [vmem:[%s2918_s2] sm:$0xff]   ;;  %v46_v50 = vadd.s32 152, %v2055_v5  ;;  %v47_v54 = vadd.s32 160, %v2055_v5 }
   0xc   :  { %1855 = vmatpush3.bf16.msra.mxu0 %v1953_v10  ;;  %1940 = vmatpush3.bf16.msra.mxu1 %v1953_v10  ;;  %105 = vst.msk [vmem:[#allocation2 + $0x68] sm:$0xff] %vm91_vm0, %v40_v34  ;;  %106 = vst.msk [vmem:[#allocation2 + $0x70] sm:$0xff] %vm91_vm0, %v41_v37  ;;  %v780_v43 = vld [vmem:[%s2919_s3 + $0x78] sm:$0xff]  ;;  %v779_v45 = vld [vmem:[%s2919_s3 + $0x70] sm:$0xff]  ;;  %v48_v56 = vadd.s32 168, %v2055_v5  ;;  %v49_v58 = vadd.s32 176, %v2055_v5 }
   0xd   :  { %1856 = vmatprep.subr.bf16.mxu0 %v1954_v19  ;;  %1933 = vmatprep.subr.bf16.mxu1 %v1954_v19  ;;  %107 = vst.msk [vmem:[#allocation2 + $0x78] sm:$0xff] %vm91_vm0, %v42_v38  ;;  %108 = vst.msk [vmem:[#allocation2 + $0x80] sm:$0xff] %vm91_vm0, %v43_v42  ;;  %v782_v46 = vld [vmem:[%s2919_s3 + $0x88] sm:$0xff]  ;;  %v781_v47 = vld [vmem:[%s2919_s3 + $0x80] sm:$0xff]  ;;  %v50_v60 = vadd.s32 184, %v2055_v5  ;;  %v51_v2 = vadd.s32 192, %v2055_v5 }
   0xe   :  { %867 = vperm.xlu1 %1950, %v772_v22   ;;  %862 = vperm.xlu0 %1949, %v771_v23   ;;  %109 = vst.msk [vmem:[#allocation2 + $0x88] sm:$0xff] %vm91_vm0, %v44_v44  ;;  %v1961_v48 = vld [vmem:[%s2917_s1 + $0x8] sm:$0xff]   ;;  %v1963_v52 = vld [vmem:[%s2917_s1 + $0x10] sm:$0xff]   ;;  %110 = vst.msk [vmem:[#allocation2 + $0x90] sm:$0xff] %vm91_vm0, %v45_v49  ;;  %v52_v4 = vadd.s32 200, %v2055_v5  ;;  %v53_v10 = vadd.s32 208, %v2055_v5 }
   0xf   :  { %v1962_v51 = vld [vmem:[%s2917_s1 + $0x88] sm:$0xff]   ;;  %111 = vst.msk [vmem:[#allocation2 + $0x98] sm:$0xff] %vm91_vm0, %v46_v50  ;;  %v1964_v53 = vld [vmem:[%s2917_s1 + $0x90] sm:$0xff]   ;;  %v784_v55 = vld [vmem:[%s2919_s3 + $0x98] sm:$0xff]  ;;  %v54_v11 = vadd.s32 216, %v2055_v5  ;;  %v55_v15 = vadd.s32 224, %v2055_v5 }
  0x10   :  { %1857 = vmatpush3.bf16.msra.mxu0 %v1954_v19  ;;  %1941 = vmatpush3.bf16.msra.mxu1 %v1954_v19  ;;  %v783_v57 = vld [vmem:[%s2919_s3 + $0x90] sm:$0xff]  ;;  %112 = vst.msk [vmem:[#allocation2 + $0xa0] sm:$0xff] %vm91_vm0, %v47_v54  ;;  %113 = vst.msk [vmem:[#allocation2 + $0xa8] sm:$0xff] %vm91_vm0, %v48_v56  ;;  %v786_v59 = vld [vmem:[%s2919_s3 + $0xa8] sm:$0xff]  ;;  %v56_v17 = vadd.s32 232, %v2055_v5  ;;  %v57_v19 = vadd.s32 240, %v2055_v5 }
  0x11   :  { %1858 = vmatprep.subr.bf16.mxu0 %v1955_v26  ;;  %1934 = vmatprep.subr.bf16.mxu1 %v1955_v26  ;;  %v785_v61 = vld [vmem:[%s2919_s3 + $0xa0] sm:$0xff]  ;;  %v1965_v62 = vld [vmem:[%s2917_s1 + $0x18] sm:$0xff]   ;;  %114 = vst.msk [vmem:[#allocation2 + $0xb0] sm:$0xff] %vm91_vm0, %v49_v58  ;;  %115 = vst.msk [vmem:[#allocation2 + $0xb8] sm:$0xff] %vm91_vm0, %v50_v60  ;;  %v58_v21 = vadd.s32 248, %v2055_v5  ;;  %v59_v27 = vadd.s32 256, %v2055_v5 }
  0x12   :  { %877 = vperm.xlu1 %1950, %v774_v24   ;;  %872 = vperm.xlu0 %1949, %v773_v25   ;;  %v1966_v63 = vld [vmem:[%s2917_s1 + $0x98] sm:$0xff]   ;;  %v1967_v0 = vld [vmem:[%s2917_s1 + $0x20] sm:$0xff]   ;;  %v787_v6 = vld [vmem:[%s2919_s3 + $0xb0] sm:$0xff]  ;;  %116 = vst.msk [vmem:[#allocation2 + $0xc0] sm:$0xff] %vm91_vm0, %v51_v2  ;;  %v60_v28 = vadd.s32 264, %v2055_v5  ;;  %v62_v32 = vadd.s32 280, %v2055_v5 }
  0x13   :  { %v1968_v1 = vld [vmem:[%s2917_s1 + $0xa0] sm:$0xff]   ;;  %v788_v3 = vld [vmem:[%s2919_s3 + $0xb8] sm:$0xff]  ;;  %117 = vst.msk [vmem:[#allocation2 + $0xc8] sm:$0xff] %vm91_vm0, %v52_v4  ;;  %v790_v7 = vld [vmem:[%s2919_s3 + $0xc8] sm:$0xff]  ;;  %v66_v44 = vadd.s32 312, %v2055_v5 }
  0x14   :  { %1859 = vmatpush3.bf16.msra.mxu0 %v1955_v26  ;;  %1942 = vmatpush3.bf16.msra.mxu1 %v1955_v26  ;;  %v789_v8 = vld [vmem:[%s2919_s3 + $0xc0] sm:$0xff]  ;;  %v1969_v9 = vld [vmem:[%s2917_s1 + $0x28] sm:$0xff]   ;;  %v1971_v13 = vld [vmem:[%s2917_s1 + $0x30] sm:$0xff]   ;;  %118 = vst.msk [vmem:[#allocation2 + $0xd0] sm:$0xff] %vm91_vm0, %v53_v10 }
  0x15   :  { %1860 = vmatprep.subr.bf16.mxu0 %v1956_v31  ;;  %1935 = vmatprep.subr.bf16.mxu1 %v1956_v31  ;;  %v1970_v12 = vld [vmem:[%s2917_s1 + $0xa8] sm:$0xff]   ;;  %119 = vst.msk [vmem:[#allocation2 + $0xd8] sm:$0xff] %vm91_vm0, %v54_v11  ;;  %v1972_v14 = vld [vmem:[%s2917_s1 + $0xb0] sm:$0xff]   ;;  %v792_v16 = vld [vmem:[%s2919_s3 + $0xd8] sm:$0xff] }
  0x16   :  { %887 = vperm.xlu1 %1950, %v776_v33   ;;  %882 = vperm.xlu0 %1949, %v775_v35   ;;  %v791_v18 = vld [vmem:[%s2919_s3 + $0xd0] sm:$0xff]  ;;  %120 = vst.msk [vmem:[#allocation2 + $0xe0] sm:$0xff] %vm91_vm0, %v55_v15  ;;  %121 = vst.msk [vmem:[#allocation2 + $0xe8] sm:$0xff] %vm91_vm0, %v56_v17  ;;  %v794_v20 = vld [vmem:[%s2919_s3 + $0xe8] sm:$0xff] }
  0x17   :  { %v793_v22 = vld [vmem:[%s2919_s3 + $0xe0] sm:$0xff]  ;;  %v1973_v23 = vld [vmem:[%s2917_s1 + $0x38] sm:$0xff]   ;;  %122 = vst.msk [vmem:[#allocation2 + $0xf0] sm:$0xff] %vm91_vm0, %v57_v19  ;;  %123 = vst.msk [vmem:[#allocation2 + $0xf8] sm:$0xff] %vm91_vm0, %v58_v21 }
  0x18   :  { %1861 = vmatpush3.bf16.msra.mxu0 %v1956_v31  ;;  %1943 = vmatpush3.bf16.msra.mxu1 %v1956_v31  ;;  %v1974_v24 = vld [vmem:[%s2917_s1 + $0xb8] sm:$0xff]   ;;  %v1975_v25 = vld [vmem:[%s2917_s1 + $0x40] sm:$0xff]   ;;  %v795_v30 = vld [vmem:[%s2919_s3 + $0xf0] sm:$0xff]  ;;  %124 = vst.msk [vmem:[#allocation2 + $0x100] sm:$0xff] %vm91_vm0, %v59_v27  ;;  %v61_v31 = vadd.s32 272, %v2055_v5 }
  0x19   :  { %1862 = vmatprep.subr.bf16.mxu0 %v1957_v36  ;;  %1936 = vmatprep.subr.bf16.mxu1 %v1957_v36  ;;  %v1976_v26 = vld [vmem:[%s2917_s1 + $0xc0] sm:$0xff]   ;;  %v796_v29 = vld [vmem:[%s2919_s3 + $0xf8] sm:$0xff]  ;;  %125 = vst.msk [vmem:[#allocation2 + $0x108] sm:$0xff] %vm91_vm0, %v60_v28  ;;  %v798_v33 = vld [vmem:[%s2919_s3 + $0x108] sm:$0xff] }
  0x1a   :  { %897 = vperm.xlu1 %1950, %v778_v39   ;;  %892 = vperm.xlu0 %1949, %v777_v40   ;;  %v797_v34 = vld [vmem:[%s2919_s3 + $0x100] sm:$0xff]  ;;  %v1977_v35 = vld [vmem:[%s2917_s1 + $0x48] sm:$0xff]   ;;  %126 = vst.msk [vmem:[#allocation2 + $0x110] sm:$0xff] %vm91_vm0, %v61_v31  ;;  %127 = vst.msk [vmem:[#allocation2 + $0x118] sm:$0xff] %vm91_vm0, %v62_v32  ;;  %v63_v39 = vadd.s32 288, %v2055_v5  ;;  %v64_v40 = vadd.s32 296, %v2055_v5 }
  0x1b   :  { %v1979_v37 = vld [vmem:[%s2917_s1 + $0x50] sm:$0xff]   ;;  %131 = vst.msk [vmem:[#allocation2 + $0x138] sm:$0xff] %vm91_vm0, %v66_v44  ;;  %v1983_v49 = vld [vmem:[%s2917_s1 + $0x60] sm:$0xff]  }
  0x1c   :  { %1863 = vmatpush3.bf16.msra.mxu0 %v1957_v36  ;;  %1944 = vmatpush3.bf16.msra.mxu1 %v1957_v36  ;;  %v1978_v36 = vld [vmem:[%s2917_s1 + $0xc8] sm:$0xff]   ;;  %v1980_v38 = vld [vmem:[%s2917_s1 + $0xd0] sm:$0xff]   ;;  %128 = vst.msk [vmem:[#allocation2 + $0x120] sm:$0xff] %vm91_vm0, %v63_v39  ;;  %129 = vst.msk [vmem:[#allocation2 + $0x128] sm:$0xff] %vm91_vm0, %v64_v40 }
  0x1d   :  { %1864 = vmatprep.subr.bf16.mxu0 %v1958_v41  ;;  %1937 = vmatprep.subr.bf16.mxu1 %v1958_v41  ;;  %v799_v42 = vld [vmem:[%s2919_s3 + $0x110] sm:$0xff]  ;;  %v1984_v50 = vld [vmem:[%s2917_s1 + $0xe0] sm:$0xff]  }
  0x1e   :  { %907 = vperm.xlu1 %1950, %v780_v43   ;;  %902 = vperm.xlu0 %1949, %v779_v45   ;;  %v65_v43 = vadd.s32 304, %v2055_v5  ;;  %v802_v45 = vld [vmem:[%s2919_s3 + $0x128] sm:$0xff] }
  0x20   :  { %1865 = vmatpush3.bf16.msra.mxu0 %v1958_v41  ;;  %1945 = vmatpush3.bf16.msra.mxu1 %v1958_v41  ;;  %v800_v41 = vld [vmem:[%s2919_s3 + $0x118] sm:$0xff]  ;;  %130 = vst.msk [vmem:[#allocation2 + $0x130] sm:$0xff] %vm91_vm0, %v65_v43 }
  0x22   :  { %917 = vperm.xlu1 %1950, %v782_v46   ;;  %912 = vperm.xlu0 %1949, %v781_v47   ;;  %v801_v46 = vld [vmem:[%s2919_s3 + $0x120] sm:$0xff]  ;;  %v1981_v47 = vld [vmem:[%s2917_s1 + $0x58] sm:$0xff]  }
  0x23   :  { %1867 = vmatmul.mubr.bf16.vlgmr.msra.gmra.mxu0 %v1961_v48  ;;  %1899 = vmatmul.mubr.bf16.vlgmr.msra.gmra.mxu1 %v1962_v51  ;;  %v1982_v48 = vld [vmem:[%s2917_s1 + $0xd8] sm:$0xff]   ;;  %v67_v51 = vadd.s32 320, %v2055_v5 }
  0x24   :  { %1870 = vmatprep.mubr.bf16.mxu0 %v1963_v52  ;;  %1902 = vmatprep.mubr.bf16.mxu1 %v1964_v53  ;;  %v68_v52 = vadd.s32 328, %v2055_v5 }
  0x26   :  { %927 = vperm.xlu1 %1950, %v784_v55   ;;  %922 = vperm.xlu0 %1949, %v783_v57  }
  0x2a   :  { %937 = vperm.xlu1 %1950, %v786_v59   ;;  %932 = vperm.xlu0 %1949, %v785_v61  }
  0x2b   :  { %1871 = vmatmul.mubr.bf16.gmra.mxu0 %v1965_v62  ;;  %1903 = vmatmul.mubr.bf16.gmra.mxu1 %v1966_v63 }
  0x2c   :  { %1874 = vmatprep.mubr.bf16.mxu0 %v1967_v0  ;;  %1906 = vmatprep.mubr.bf16.mxu1 %v1968_v1 }
  0x2e   :  { %947 = vperm.xlu1 %1950, %v788_v3   ;;  %942 = vperm.xlu0 %1949, %v787_v6  }
  0x32   :  { %957 = vperm.xlu1 %1950, %v790_v7   ;;  %952 = vperm.xlu0 %1949, %v789_v8  }
  0x33   :  { %1875 = vmatmul.mubr.bf16.gmra.mxu0 %v1969_v9  ;;  %1907 = vmatmul.mubr.bf16.gmra.mxu1 %v1970_v12 }
  0x34   :  { %1878 = vmatprep.mubr.bf16.mxu0 %v1971_v13  ;;  %1910 = vmatprep.mubr.bf16.mxu1 %v1972_v14 }
  0x36   :  { %967 = vperm.xlu1 %1950, %v792_v16   ;;  %962 = vperm.xlu0 %1949, %v791_v18  }
  0x3a   :  { %977 = vperm.xlu1 %1950, %v794_v20   ;;  %972 = vperm.xlu0 %1949, %v793_v22  }
  0x3b   :  { %1879 = vmatmul.mubr.bf16.gmra.mxu0 %v1973_v23  ;;  %1911 = vmatmul.mubr.bf16.gmra.mxu1 %v1974_v24 }
  0x3c   :  { %1882 = vmatprep.mubr.bf16.mxu0 %v1975_v25  ;;  %1914 = vmatprep.mubr.bf16.mxu1 %v1976_v26 }
  0x3e   :  { %987 = vperm.xlu1 %1950, %v796_v29   ;;  %982 = vperm.xlu0 %1949, %v795_v30  }
  0x42   :  { %997 = vperm.xlu1 %1950, %v798_v33   ;;  %992 = vperm.xlu0 %1949, %v797_v34  }
  0x43   :  { %1883 = vmatmul.mubr.bf16.gmra.mxu0 %v1977_v35  ;;  %1915 = vmatmul.mubr.bf16.gmra.mxu1 %v1978_v36 }
  0x44   :  { %1886 = vmatprep.mubr.bf16.mxu0 %v1979_v37  ;;  %1918 = vmatprep.mubr.bf16.mxu1 %v1980_v38 }
  0x46   :  { %1007 = vperm.xlu1 %1950, %v800_v41   ;;  %1002 = vperm.xlu0 %1949, %v799_v42  }
  0x47   :  { %11 = vsyncpa [#allocation6], 0  ;;  %v804_v53 = vld [vmem:[%s2919_s3 + $0x138] sm:$0xff]  ;;  %v803_v54 = vld [vmem:[%s2919_s3 + $0x130] sm:$0xff]  ;;  %132 = vst.msk [vmem:[#allocation2 + $0x140] sm:$0xff] %vm91_vm0, %v67_v51  ;;  %v69_v55 = vadd.s32 336, %v2055_v5 }
  0x48   :  { %133 = vst.msk [vmem:[#allocation2 + $0x148] sm:$0xff] %vm91_vm0, %v68_v52  ;;  %v70_v56 = vadd.s32 344, %v2055_v5  ;;  %v806_v57 = vld [vmem:[%s2919_s3 + $0x148] sm:$0xff]  ;;  %v805_v58 = vld [vmem:[%s2919_s3 + $0x140] sm:$0xff]  ;;  %v1987_v61 = vld [vmem:[%s2917_s1 + $0x70] sm:$0xff]   ;;  %v71_v63 = vadd.s32 352, %v2055_v5 }
  0x49   :  { %v1985_v59 = vld [vmem:[%s2917_s1 + $0x68] sm:$0xff]   ;;  %134 = vst.msk [vmem:[#allocation2 + $0x150] sm:$0xff] %vm91_vm0, %v69_v55  ;;  %v1988_v62 = vld [vmem:[%s2917_s1 + $0xf0] sm:$0xff]   ;;  %v72_v0 = vadd.s32 360, %v2055_v5  ;;  %v808_v1 = vld [vmem:[%s2919_s3 + $0x158] sm:$0xff]  ;;  %v73_v3 = vadd.s32 368, %v2055_v5 }
  0x4a   :  { %1017 = vperm.xlu1 %1950, %v802_v45   ;;  %1012 = vperm.xlu0 %1949, %v801_v46   ;;  %v1986_v60 = vld [vmem:[%s2917_s1 + $0xe8] sm:$0xff]   ;;  %135 = vst.msk [vmem:[#allocation2 + $0x158] sm:$0xff] %vm91_vm0, %v70_v56  ;;  %v807_v2 = vld [vmem:[%s2919_s3 + $0x150] sm:$0xff]  ;;  %136 = vst.msk [vmem:[#allocation2 + $0x160] sm:$0xff] %vm91_vm0, %v71_v63  ;;  %v74_v4 = vadd.s32 376, %v2055_v5  ;;  %v75_v10 = vadd.s32 384, %v2055_v5 }
  0x4b   :  { %1887 = vmatmul.mubr.bf16.gmra.mxu0 %v1981_v47  ;;  %1919 = vmatmul.mubr.bf16.gmra.mxu1 %v1982_v48  ;;  %137 = vst.msk [vmem:[#allocation2 + $0x168] sm:$0xff] %vm91_vm0, %v72_v0  ;;  %v810_v6 = vld [vmem:[%s2919_s3 + $0x168] sm:$0xff]  ;;  %v809_v7 = vld [vmem:[%s2919_s3 + $0x160] sm:$0xff]  ;;  %v1989_v8 = vld [vmem:[%s2917_s1 + $0x78] sm:$0xff]   ;;  %v76_v11 = vadd.s32 392, %v2055_v5  ;;  %v77_v14 = vadd.s32 400, %v2055_v5 }
  0x4c   :  { %1890 = vmatprep.mubr.bf16.mxu0 %v1983_v49  ;;  %1922 = vmatprep.mubr.bf16.mxu1 %v1984_v50  ;;  %v1990_v9 = vld [vmem:[%s2917_s1 + $0xf8] sm:$0xff]   ;;  %138 = vst.msk [vmem:[#allocation2 + $0x170] sm:$0xff] %vm91_vm0, %v73_v3  ;;  %139 = vst.msk [vmem:[#allocation2 + $0x178] sm:$0xff] %vm91_vm0, %v74_v4  ;;  %v811_v13 = vld [vmem:[%s2919_s3 + $0x170] sm:$0xff]  ;;  %v78_v15 = vadd.s32 408, %v2055_v5  ;;  %v79_v18 = vadd.s32 416, %v2055_v5 }
  0x4d   :  { %v812_v12 = vld [vmem:[%s2919_s3 + $0x178] sm:$0xff]  ;;  %140 = vst.msk [vmem:[#allocation2 + $0x180] sm:$0xff] %vm91_vm0, %v75_v10  ;;  %141 = vst.msk [vmem:[#allocation2 + $0x188] sm:$0xff] %vm91_vm0, %v76_v11  ;;  %v814_v16 = vld [vmem:[%s2919_s3 + $0x188] sm:$0xff]  ;;  %v80_v19 = vadd.s32 424, %v2055_v5  ;;  %v81_v22 = vadd.s32 432, %v2055_v5 }
  0x4e   :  { %1027 = vperm.xlu1 %1950, %v804_v53   ;;  %1022 = vperm.xlu0 %1949, %v803_v54   ;;  %v813_v17 = vld [vmem:[%s2919_s3 + $0x180] sm:$0xff]  ;;  %142 = vst.msk [vmem:[#allocation2 + $0x190] sm:$0xff] %vm91_vm0, %v77_v14  ;;  %143 = vst.msk [vmem:[#allocation2 + $0x198] sm:$0xff] %vm91_vm0, %v78_v15  ;;  %v816_v20 = vld [vmem:[%s2919_s3 + $0x198] sm:$0xff]  ;;  %v82_v23 = vadd.s32 440, %v2055_v5  ;;  %v83_v26 = vadd.s32 448, %v2055_v5 }
  0x4f   :  { %v815_v21 = vld [vmem:[%s2919_s3 + $0x190] sm:$0xff]  ;;  %144 = vst.msk [vmem:[#allocation2 + $0x1a0] sm:$0xff] %vm91_vm0, %v79_v18  ;;  %145 = vst.msk [vmem:[#allocation2 + $0x1a8] sm:$0xff] %vm91_vm0, %v80_v19  ;;  %v818_v24 = vld [vmem:[%s2919_s3 + $0x1a8] sm:$0xff]  ;;  %v84_v27 = vadd.s32 456, %v2055_v5  ;;  %v85_v30 = vadd.s32 464, %v2055_v5 }
  0x50   :  { %v817_v25 = vld [vmem:[%s2919_s3 + $0x1a0] sm:$0xff]  ;;  %146 = vst.msk [vmem:[#allocation2 + $0x1b0] sm:$0xff] %vm91_vm0, %v81_v22  ;;  %147 = vst.msk [vmem:[#allocation2 + $0x1b8] sm:$0xff] %vm91_vm0, %v82_v23  ;;  %v820_v28 = vld [vmem:[%s2919_s3 + $0x1b8] sm:$0xff]  ;;  %v86_v31 = vadd.s32 472, %v2055_v5  ;;  %v87_v34 = vadd.s32 480, %v2055_v5 }
  0x51   :  { %v819_v29 = vld [vmem:[%s2919_s3 + $0x1b0] sm:$0xff]  ;;  %148 = vst.msk [vmem:[#allocation2 + $0x1c0] sm:$0xff] %vm91_vm0, %v83_v26  ;;  %149 = vst.msk [vmem:[#allocation2 + $0x1c8] sm:$0xff] %vm91_vm0, %v84_v27  ;;  %v822_v32 = vld [vmem:[%s2919_s3 + $0x1c8] sm:$0xff]  ;;  %v88_v35 = vadd.s32 488, %v2055_v5  ;;  %v89_v38 = vadd.s32 496, %v2055_v5 }
  0x52   :  { %1037 = vperm.xlu1 %1950, %v806_v57   ;;  %1032 = vperm.xlu0 %1949, %v805_v58   ;;  %v821_v33 = vld [vmem:[%s2919_s3 + $0x1c0] sm:$0xff]  ;;  %150 = vst.msk [vmem:[#allocation2 + $0x1d0] sm:$0xff] %vm91_vm0, %v85_v30  ;;  %151 = vst.msk [vmem:[#allocation2 + $0x1d8] sm:$0xff] %vm91_vm0, %v86_v31  ;;  %v824_v36 = vld [vmem:[%s2919_s3 + $0x1d8] sm:$0xff]  ;;  %v90_v39 = vadd.s32 504, %v2055_v5 }
  0x53   :  { %1891 = vmatmul.mubr.bf16.gmra.mxu0 %v1985_v59  ;;  %1923 = vmatmul.mubr.bf16.gmra.mxu1 %v1986_v60  ;;  %v823_v37 = vld [vmem:[%s2919_s3 + $0x1d0] sm:$0xff]  ;;  %152 = vst.msk [vmem:[#allocation2 + $0x1e0] sm:$0xff] %vm91_vm0, %v87_v34  ;;  %153 = vst.msk [vmem:[#allocation2 + $0x1e8] sm:$0xff] %vm91_vm0, %v88_v35  ;;  %v826_v40 = vld [vmem:[%s2919_s3 + $0x1e8] sm:$0xff] }
  0x54   :  { %1894 = vmatprep.mubr.bf16.mxu0 %v1987_v61  ;;  %1926 = vmatprep.mubr.bf16.mxu1 %v1988_v62  ;;  %v825_v41 = vld [vmem:[%s2919_s3 + $0x1e0] sm:$0xff]  ;;  %154 = vst.msk [vmem:[#allocation2 + $0x1f0] sm:$0xff] %vm91_vm0, %v89_v38  ;;  %155 = vst.msk [vmem:[#allocation2 + $0x1f8] sm:$0xff] %vm91_vm0, %v90_v39  ;;  %v828_v42 = vld [vmem:[%s2919_s3 + $0x1f8] sm:$0xff] }
  0x55   :  { %v827_v5 = vld [vmem:[%s2919_s3 + $0x1f0] sm:$0xff]  ;;  %v1284_v45 = vld [vmem:[#allocation2] sm:$0xff]  ;;  %v1285_v46 = vld [vmem:[#allocation2 + $0x8] sm:$0xff] }
  0x56   :  { %1047 = vperm.xlu1 %1950, %v808_v1   ;;  %1042 = vperm.xlu0 %1949, %v807_v2   ;;  %v1286_v49 = vld [vmem:[#allocation2 + $0x10] sm:$0xff]  ;;  %v1287_v50 = vld [vmem:[#allocation2 + $0x18] sm:$0xff]  ;;  %v1288_v53 = vld [vmem:[#allocation2 + $0x20] sm:$0xff] }
  0x57   :  { %v1289_v54 = vld [vmem:[#allocation2 + $0x28] sm:$0xff]  ;;  %v1290_v57 = vld [vmem:[#allocation2 + $0x30] sm:$0xff]  ;;  %v1291_v58 = vld [vmem:[#allocation2 + $0x38] sm:$0xff] }
  0x58   :  { %v1292_v61 = vld [vmem:[#allocation2 + $0x40] sm:$0xff]  ;;  %v1293_v62 = vld [vmem:[#allocation2 + $0x48] sm:$0xff]  ;;  %v1294_v1 = vld [vmem:[#allocation2 + $0x50] sm:$0xff] }
  0x59   :  { %v1295_v2 = vld [vmem:[#allocation2 + $0x58] sm:$0xff]  ;;  %v1298_v10 = vld [vmem:[#allocation2 + $0x70] sm:$0xff]  ;;  %v1300_v14 = vld [vmem:[#allocation2 + $0x80] sm:$0xff] }
  0x5a   :  { %1057 = vperm.xlu1 %1950, %v810_v6   ;;  %1052 = vperm.xlu0 %1949, %v809_v7   ;;  %v1296_v6 = vld [vmem:[#allocation2 + $0x60] sm:$0xff]  ;;  %v1297_v7 = vld [vmem:[#allocation2 + $0x68] sm:$0xff]  ;;  %v1299_v11 = vld [vmem:[#allocation2 + $0x78] sm:$0xff] }
  0x5b   :  { %1895 = vmatmul.mubr.bf16.gmra.mxu0 %v1989_v8  ;;  %1927 = vmatmul.mubr.bf16.gmra.mxu1 %v1990_v9  ;;  %v1301_v15 = vld [vmem:[#allocation2 + $0x88] sm:$0xff]  ;;  %v1302_v18 = vld [vmem:[#allocation2 + $0x90] sm:$0xff]  ;;  %v1303_v19 = vld [vmem:[#allocation2 + $0x98] sm:$0xff] }
  0x5c   :  { %v1304_v22 = vld [vmem:[#allocation2 + $0xa0] sm:$0xff]  ;;  %v1305_v23 = vld [vmem:[#allocation2 + $0xa8] sm:$0xff]  ;;  %v1306_v26 = vld [vmem:[#allocation2 + $0xb0] sm:$0xff] }
  0x5d   :  { %v1307_v27 = vld [vmem:[#allocation2 + $0xb8] sm:$0xff]  ;;  %v1308_v30 = vld [vmem:[#allocation2 + $0xc0] sm:$0xff]  ;;  %v1309_v31 = vld [vmem:[#allocation2 + $0xc8] sm:$0xff] }
  0x5e   :  { %1067 = vperm.xlu1 %1950, %v812_v12   ;;  %1062 = vperm.xlu0 %1949, %v811_v13   ;;  %v1310_v34 = vld [vmem:[#allocation2 + $0xd0] sm:$0xff]  ;;  %v1311_v35 = vld [vmem:[#allocation2 + $0xd8] sm:$0xff]  ;;  %v1312_v38 = vld [vmem:[#allocation2 + $0xe0] sm:$0xff] }
  0x5f   :  { %v1313_v39 = vld [vmem:[#allocation2 + $0xe8] sm:$0xff] }
  0x62   :  { %1077 = vperm.xlu1 %1950, %v814_v16   ;;  %1072 = vperm.xlu0 %1949, %v813_v17  }
  0x66   :  { %1087 = vperm.xlu1 %1950, %v816_v20   ;;  %1082 = vperm.xlu0 %1949, %v815_v21  }
  0x6a   :  { %1097 = vperm.xlu1 %1950, %v818_v24   ;;  %1092 = vperm.xlu0 %1949, %v817_v25  }
  0x6e   :  { %1107 = vperm.xlu1 %1950, %v820_v28   ;;  %1102 = vperm.xlu0 %1949, %v819_v29  }
  0x72   :  { %1117 = vperm.xlu1 %1950, %v822_v32   ;;  %1112 = vperm.xlu0 %1949, %v821_v33  }
  0x76   :  { %1127 = vperm.xlu1 %1950, %v824_v36   ;;  %1122 = vperm.xlu0 %1949, %v823_v37  }
  0x7a   :  { %1137 = vperm.xlu1 %1950, %v826_v40   ;;  %1132 = vperm.xlu0 %1949, %v825_v41  }
  0x7d   :  { %v2488_v43 = vpop.permute.xlu1 %842  ;;  %v2490_v44 = vpop.permute.xlu0 %832 }
  0x7e   :  { %1147 = vperm.xlu1 %1950, %v828_v42   ;;  %1142 = vperm.xlu0 %1949, %v827_v5   ;;  %v1314_v42 = vld [vmem:[#allocation2 + $0xf0] sm:$0xff]  ;;  %v1315_v5 = vld [vmem:[#allocation2 + $0xf8] sm:$0xff] }
  0x81   :  { %v2492_v47 = vpop.permute.xlu1 %847  ;;  %v2494_v48 = vpop.permute.xlu0 %837 }
  0x82   :  { %1349 = vperm.xlu0 %1949, %v1284_v45   ;;  %1352 = vperm.xlu1 %1950, %v1285_v46  }
  0x85   :  { %v2496_v51 = vpop.permute.xlu1 %857  ;;  %v2498_v52 = vpop.permute.xlu0 %852 }
  0x86   :  { %1355 = vperm.xlu0 %1949, %v1286_v49   ;;  %1358 = vperm.xlu1 %1950, %v1287_v50   ;;  %v1316_v49 = vld [vmem:[#allocation2 + $0x100] sm:$0xff]  ;;  %v1317_v50 = vld [vmem:[#allocation2 + $0x108] sm:$0xff] }
  0x89   :  { %v2500_v55 = vpop.permute.xlu1 %867  ;;  %v2502_v56 = vpop.permute.xlu0 %862 }
  0x8a   :  { %1361 = vperm.xlu0 %1949, %v1288_v53   ;;  %1364 = vperm.xlu1 %1950, %v1289_v54  }
  0x8d   :  { %v2504_v59 = vpop.permute.xlu1 %877  ;;  %v2506_v60 = vpop.permute.xlu0 %872 }
  0x8e   :  { %1367 = vperm.xlu0 %1949, %v1290_v57   ;;  %1370 = vperm.xlu1 %1950, %v1291_v58   ;;  %v1318_v57 = vld [vmem:[#allocation2 + $0x110] sm:$0xff]  ;;  %v1319_v58 = vld [vmem:[#allocation2 + $0x118] sm:$0xff] }
  0x91   :  { %v2508_v63 = vpop.permute.xlu1 %887  ;;  %v2510_v0 = vpop.permute.xlu0 %882 }
  0x92   :  { %1373 = vperm.xlu0 %1949, %v1292_v61   ;;  %1376 = vperm.xlu1 %1950, %v1293_v62  }
  0x95   :  { %v2512_v3 = vpop.permute.xlu1 %897  ;;  %v2514_v4 = vpop.permute.xlu0 %892 }
  0x96   :  { %1379 = vperm.xlu0 %1949, %v1294_v1   ;;  %1382 = vperm.xlu1 %1950, %v1295_v2   ;;  %v1320_v1 = vld [vmem:[#allocation2 + $0x120] sm:$0xff]  ;;  %v1321_v2 = vld [vmem:[#allocation2 + $0x128] sm:$0xff] }
  0x99   :  { %v2516_v8 = vpop.permute.xlu1 %907  ;;  %v2518_v9 = vpop.permute.xlu0 %902 }
  0x9a   :  { %1385 = vperm.xlu0 %1949, %v1296_v6   ;;  %1388 = vperm.xlu1 %1950, %v1297_v7  }
  0x9d   :  { %v2520_v12 = vpop.permute.xlu1 %917  ;;  %v2522_v13 = vpop.permute.xlu0 %912 }
  0x9e   :  { %1391 = vperm.xlu0 %1949, %v1298_v10   ;;  %1394 = vperm.xlu1 %1950, %v1299_v11   ;;  %v1322_v10 = vld [vmem:[#allocation2 + $0x130] sm:$0xff]  ;;  %v1323_v11 = vld [vmem:[#allocation2 + $0x138] sm:$0xff] }
  0xa1   :  { %v2524_v16 = vpop.permute.xlu1 %927  ;;  %v2526_v17 = vpop.permute.xlu0 %922 }
  0xa2   :  { %1397 = vperm.xlu0 %1949, %v1300_v14   ;;  %1400 = vperm.xlu1 %1950, %v1301_v15  }
  0xa5   :  { %v2528_v20 = vpop.permute.xlu1 %937  ;;  %v2530_v21 = vpop.permute.xlu0 %932 }
  0xa6   :  { %1403 = vperm.xlu0 %1949, %v1302_v18   ;;  %1406 = vperm.xlu1 %1950, %v1303_v19   ;;  %v1324_v18 = vld [vmem:[#allocation2 + $0x140] sm:$0xff]  ;;  %v1325_v19 = vld [vmem:[#allocation2 + $0x148] sm:$0xff] }
  0xa9   :  { %v2532_v24 = vpop.permute.xlu1 %947  ;;  %v2534_v25 = vpop.permute.xlu0 %942 }
  0xaa   :  { %1409 = vperm.xlu0 %1949, %v1304_v22   ;;  %1412 = vperm.xlu1 %1950, %v1305_v23  }
  0xad   :  { %v2536_v28 = vpop.permute.xlu1 %957  ;;  %v2538_v29 = vpop.permute.xlu0 %952 }
  0xae   :  { %1415 = vperm.xlu0 %1949, %v1306_v26   ;;  %1418 = vperm.xlu1 %1950, %v1307_v27   ;;  %v1326_v26 = vld [vmem:[#allocation2 + $0x150] sm:$0xff]  ;;  %v1327_v27 = vld [vmem:[#allocation2 + $0x158] sm:$0xff] }
  0xb1   :  { %v2540_v32 = vpop.permute.xlu1 %967  ;;  %v2542_v33 = vpop.permute.xlu0 %962 }
  0xb2   :  { %1421 = vperm.xlu0 %1949, %v1308_v30   ;;  %1424 = vperm.xlu1 %1950, %v1309_v31  }
  0xb5   :  { %v2544_v36 = vpop.permute.xlu1 %977  ;;  %v2546_v37 = vpop.permute.xlu0 %972 }
  0xb6   :  { %1427 = vperm.xlu0 %1949, %v1310_v34   ;;  %1430 = vperm.xlu1 %1950, %v1311_v35   ;;  %v1328_v34 = vld [vmem:[#allocation2 + $0x160] sm:$0xff]  ;;  %v1329_v35 = vld [vmem:[#allocation2 + $0x168] sm:$0xff] }
  0xb9   :  { %v2548_v40 = vpop.permute.xlu1 %987  ;;  %v2550_v41 = vpop.permute.xlu0 %982 }
  0xba   :  { %1433 = vperm.xlu0 %1949, %v1312_v38   ;;  %1436 = vperm.xlu1 %1950, %v1313_v39  }
  0xbd   :  { %v2552_v45 = vpop.permute.xlu1 %997  ;;  %v2554_v46 = vpop.permute.xlu0 %992 }
  0xbe   :  { %2922 = vst [vmem:[#allocation8_spill] sm:$0xff] %v2554_v46  ;;  %1439 = vperm.xlu0 %1949, %v1314_v42   ;;  %1442 = vperm.xlu1 %1950, %v1315_v5   ;;  %v1330_v42 = vld [vmem:[#allocation2 + $0x170] sm:$0xff]  ;;  %v1331_v5 = vld [vmem:[#allocation2 + $0x178] sm:$0xff] }
  0xc1   :  { %v2556_v53 = vpop.permute.xlu1 %1007  ;;  %v2558_v54 = vpop.permute.xlu0 %1002 }
  0xc2   :  { %2923 = vst [vmem:[#allocation9_spill] sm:$0xff] %v2556_v53  ;;  %2924 = vst [vmem:[#allocation10_spill] sm:$0xff] %v2558_v54  ;;  %1445 = vperm.xlu0 %1949, %v1316_v49   ;;  %1448 = vperm.xlu1 %1950, %v1317_v50  }
  0xc5   :  { %v2560_v61 = vpop.permute.xlu1 %1017  ;;  %v2562_v62 = vpop.permute.xlu0 %1012 }
  0xc6   :  { %2925 = vst [vmem:[#allocation11_spill] sm:$0xff] %v2560_v61  ;;  %2926 = vst [vmem:[#allocation12_spill] sm:$0xff] %v2562_v62  ;;  %1451 = vperm.xlu0 %1949, %v1318_v57   ;;  %1454 = vperm.xlu1 %1950, %v1319_v58   ;;  %v1332_v57 = vld [vmem:[#allocation2 + $0x180] sm:$0xff]  ;;  %v1333_v58 = vld [vmem:[#allocation2 + $0x188] sm:$0xff] }
  0xc9   :  { %v2564_v6 = vpop.permute.xlu1 %1027  ;;  %v2566_v7 = vpop.permute.xlu0 %1022 }
  0xca   :  { %2927 = vst [vmem:[#allocation13_spill] sm:$0xff] %v2564_v6  ;;  %2928 = vst [vmem:[#allocation14_spill] sm:$0xff] %v2566_v7  ;;  %1457 = vperm.xlu0 %1949, %v1320_v1   ;;  %1460 = vperm.xlu1 %1950, %v1321_v2  }
  0xcd   :  { %v2568_v14 = vpop.permute.xlu1 %1037  ;;  %v2570_v15 = vpop.permute.xlu0 %1032 }
  0xce   :  { %2929 = vst [vmem:[#allocation15_spill] sm:$0xff] %v2568_v14  ;;  %2930 = vst [vmem:[#allocation16_spill] sm:$0xff] %v2570_v15  ;;  %1463 = vperm.xlu0 %1949, %v1322_v10   ;;  %1466 = vperm.xlu1 %1950, %v1323_v11   ;;  %v1334_v11 = vld [vmem:[#allocation2 + $0x190] sm:$0xff] }
  0xd1   :  { %v2572_v22 = vpop.permute.xlu1 %1047  ;;  %v2574_v23 = vpop.permute.xlu0 %1042 }
  0xd2   :  { %2931 = vst [vmem:[#allocation17_spill] sm:$0xff] %v2572_v22  ;;  %2932 = vst [vmem:[#allocation18_spill] sm:$0xff] %v2574_v23  ;;  %1469 = vperm.xlu0 %1949, %v1324_v18   ;;  %1472 = vperm.xlu1 %1950, %v1325_v19   ;;  %v1335_v18 = vld [vmem:[#allocation2 + $0x198] sm:$0xff] }
  0xd5   :  { %v2576_v30 = vpop.permute.xlu1 %1057  ;;  %v2578_v31 = vpop.permute.xlu0 %1052 }
  0xd6   :  { %2933 = vst [vmem:[#allocation19_spill] sm:$0xff] %v2576_v30  ;;  %2934 = vst [vmem:[#allocation20_spill] sm:$0xff] %v2578_v31  ;;  %1475 = vperm.xlu0 %1949, %v1326_v26   ;;  %1478 = vperm.xlu1 %1950, %v1327_v27   ;;  %v1345_v30 = vld [vmem:[#allocation2 + $0x1e8] sm:$0xff] }
  0xd9   :  { %v2580_v38 = vpop.permute.xlu1 %1067  ;;  %v2582_v39 = vpop.permute.xlu0 %1062 }
  0xda   :  { %2935 = vst [vmem:[#allocation21_spill] sm:$0xff] %v2580_v38  ;;  %2936 = vst [vmem:[#allocation22_spill] sm:$0xff] %v2582_v39  ;;  %1481 = vperm.xlu0 %1949, %v1328_v34   ;;  %1484 = vperm.xlu1 %1950, %v1329_v35   ;;  %v1336_v34 = vld [vmem:[#allocation2 + $0x1a0] sm:$0xff]  ;;  %v1337_v35 = vld [vmem:[#allocation2 + $0x1a8] sm:$0xff] }
  0xdb   :  { %v1343_v38 = vld [vmem:[#allocation2 + $0x1d8] sm:$0xff] }
  0xdd   :  { %v2584_v49 = vpop.permute.xlu1 %1077  ;;  %v2586_v50 = vpop.permute.xlu0 %1072 }
  0xde   :  { %2937 = vst [vmem:[#allocation23_spill] sm:$0xff] %v2584_v49  ;;  %2938 = vst [vmem:[#allocation24_spill] sm:$0xff] %v2586_v50  ;;  %1487 = vperm.xlu0 %1949, %v1330_v42   ;;  %1490 = vperm.xlu1 %1950, %v1331_v5   ;;  %v1340_v50 = vld [vmem:[#allocation2 + $0x1c0] sm:$0xff]  ;;  %v1341_v49 = vld [vmem:[#allocation2 + $0x1c8] sm:$0xff] }
  0xe1   :  { %v2588_v1 = vpop.permute.xlu1 %1087  ;;  %v2590_v2 = vpop.permute.xlu0 %1082 }
  0xe2   :  { %2939 = vst [vmem:[#allocation25_spill] sm:$0xff] %v2588_v1  ;;  %2940 = vst [vmem:[#allocation26_spill] sm:$0xff] %v2590_v2  ;;  %1493 = vperm.xlu0 %1949, %v1332_v57   ;;  %1496 = vperm.xlu1 %1950, %v1333_v58   ;;  %v1338_v2 = vld [vmem:[#allocation2 + $0x1b0] sm:$0xff] }
  0xe3   :  { %v2592_v10 = vpop.f32.mrf.mxu0 }
  0xe5   :  { %v2594_v19 = vpop.permute.xlu1 %1097  ;;  %v2596_v26 = vpop.permute.xlu0 %1092 }
  0xe6   :  { %2941 = vst [vmem:[#allocation27_spill] sm:$0xff] %v2594_v19  ;;  %2942 = vst [vmem:[#allocation28_spill] sm:$0xff] %v2596_v26  ;;  %v2598_v27 = vpop.f32.mrf.mxu0  ;;  %1499 = vperm.xlu0 %1949, %v1334_v11   ;;  %1502 = vperm.xlu1 %1950, %v1335_v18   ;;  %v1339_v19 = vld [vmem:[#allocation2 + $0x1b8] sm:$0xff] }
  0xe8   :  { %v2600_v42 = vpop.f32.mrf.mxu0 }
  0xe9   :  { %v2602_v5 = vpop.permute.xlu1 %1107  ;;  %v2604_v57 = vpop.permute.xlu0 %1102 }
  0xea   :  { %2943 = vst [vmem:[#allocation29_spill] sm:$0xff] %v2602_v5  ;;  %2944 = vst [vmem:[#allocation30_spill] sm:$0xff] %v2604_v57  ;;  %v2606_v58 = vpop.f32.mrf.mxu0  ;;  %1505 = vperm.xlu0 %1949, %v1336_v34   ;;  %1508 = vperm.xlu1 %1950, %v1337_v35   ;;  %v1342_v35 = vld [vmem:[#allocation2 + $0x1d0] sm:$0xff] }
  0xec   :  { %v2608_v1 = vpop.f32.mrf.mxu0 }
  0xed   :  { %v2610_v26 = vpop.permute.xlu1 %1117  ;;  %v2612_v11 = vpop.permute.xlu0 %1112 }
  0xee   :  { %2945 = vst [vmem:[#allocation31_spill] sm:$0xff] %v2610_v26  ;;  %2946 = vst [vmem:[#allocation32_spill] sm:$0xff] %v2612_v11  ;;  %v526_v18 = vpop.f32.mrf.mxu0  ;;  %1511 = vperm.xlu0 %1949, %v1338_v2   ;;  %1514 = vperm.xlu1 %1950, %v1339_v19   ;;  %v2626_v2 = vpop.f32.mrf.mxu1 }
  0xef   :  { %2951 = vst [vmem:[#allocation37_spill] sm:$0xff] %v2626_v2 }
  0xf0   :  { %v2614_v5 = vpop.f32.mrf.mxu0  ;;  %v2636_v23 = vpop.f32.mrf.mxu1 }
  0xf1   :  { %v2616_v57 = vpop.permute.xlu1 %1127  ;;  %v2618_v39 = vpop.permute.xlu0 %1122  ;;  %2954 = vst [vmem:[#allocation40_spill] sm:$0xff] %v2636_v23 }
  0xf2   :  { %2947 = vst [vmem:[#allocation33_spill] sm:$0xff] %v2616_v57  ;;  %2948 = vst [vmem:[#allocation34_spill] sm:$0xff] %v2618_v39  ;;  %v529_v34 = vpop.f32.mrf.mxu0  ;;  %1517 = vperm.xlu0 %1949, %v1340_v50   ;;  %1520 = vperm.xlu1 %1950, %v1341_v49   ;;  %v1344_v57 = vld [vmem:[#allocation2 + $0x1e0] sm:$0xff]  ;;  %v2642_v14 = vpop.f32.mrf.mxu1 }
  0xf3   :  { %2955 = vst [vmem:[#allocation41_spill] sm:$0xff] %v2642_v14 }
  0xf4   :  { %v2620_v31 = vpop.f32.mrf.mxu0  ;;  %v2655_v62 = vpop.f32.mrf.mxu1 }
  0xf5   :  { %v2622_v26 = vpop.permute.xlu1 %1137  ;;  %v2624_v11 = vpop.permute.xlu0 %1132  ;;  %2956 = vst [vmem:[#allocation42_spill] sm:$0xff] %v2655_v62 }
  0xf6   :  { %2949 = vst [vmem:[#allocation35_spill] sm:$0xff] %v2622_v26  ;;  %2950 = vst [vmem:[#allocation36_spill] sm:$0xff] %v2624_v11  ;;  %v2628_v19 = vpop.f32.mrf.mxu0  ;;  %1523 = vperm.xlu0 %1949, %v1342_v35   ;;  %1526 = vperm.xlu1 %1950, %v1343_v38   ;;  %v1346_v11 = vld [vmem:[#allocation2 + $0x1f0] sm:$0xff]  ;;  %v1347_v26 = vld [vmem:[#allocation2 + $0x1f8] sm:$0xff]  ;;  %v2673_v62 = vpop.f32.mrf.mxu1 }
  0xf8   :  { %v2630_v39 = vpop.f32.mrf.mxu0 }
  0xf9   :  { %v2632_v50 = vpop.permute.xlu1 %1147  ;;  %v2634_v49 = vpop.permute.xlu0 %1142 }
  0xfa   :  { %2952 = vst [vmem:[#allocation38_spill] sm:$0xff] %v2632_v50  ;;  %2953 = vst [vmem:[#allocation39_spill] sm:$0xff] %v2634_v49  ;;  %v2638_v22 = vpop.f32.mrf.mxu0  ;;  %1529 = vperm.xlu0 %1949, %v1344_v57   ;;  %1532 = vperm.xlu1 %1950, %v1345_v30   ;;  %v2649_v49 = vld [vmem:[%s2920_s4] ss:$0 sm:$0xff]  ;;  %s2015_s4 = smov [#allocation5]  }
  0xfb   :  { %v1156_v6 = vadd.f32 %v2649_v49, %v2490_v44  ;;  %v1160_v14 = vadd.f32 %v2649_v49, %v2498_v52  ;;  %v1158_v2 = vadd.f32 %v2649_v49, %v2488_v43  ;;  %v1159_v54 = vadd.f32 %v2649_v49, %v2492_v47  ;;  %s1761_s19 = sshll.u32 %s2015_s4, 4  ;;  %s1762_s19 = int_to_ptr.vmem [resolvable:$true] %s1761_s19 }
  0xfc   :  { %v2640_v15 = vpop.f32.mrf.mxu0  ;;  %v1163_v47 = vadd.f32 %v2649_v49, %v2500_v55  ;;  %s1991_s21 = scalar_lea.vmem %s1762_s19, 16  ;;  %s1995_s22 = scalar_lea.vmem %s1762_s19, 32 }
  0xfd   :  { %v1350_v35 = vpop.permute.xlu0 %1349  ;;  %v1353_v38 = vpop.permute.xlu1 %1352  ;;  %vm1220_vm1 = vcmp.lt.f32.partialorder %v1156_v6, %v2598_v27  ;;  %vm1224_vm3 = vcmp.lt.f32.partialorder %v1160_v14, %v526_v18  ;;  %v1162_v6 = vadd.f32 %v2649_v49, %v2502_v56  ;;  %v2014_v14 = vmov 512   ;;  %p1992_p0 = scmp.ne.s32.totalorder %s1762_s19, %s1991_s21  ;;  %p1996_p1 = scmp.lt.s32.totalorder %s1762_s19, %s1762_s19 }
  0xfe   :  { %v2644_v7 = vpop.f32.mrf.mxu0  ;;  %1535 = vperm.xlu0 %1949, %v1346_v11   ;;  %1538 = vperm.xlu1 %1950, %v1347_v26   ;;  %v1157_v11 = vadd.f32 %v2649_v49, %v2494_v48  ;;  %v1161_v26 = vadd.f32 %v2649_v49, %v2496_v51  ;;  %v1540_v48 = vsel %vm1220_vm1, %v1350_v35, 512  ;;  %25 = vst [vmem:[#allocation5] sm:$0x1] %v2014_v14  ;;  %p1997_p2 = scmp.lt.s32.totalorder %s1995_s22, %s1991_s21 }
  0xff   :  { %vm1222_vm7 = vcmp.lt.f32.partialorder %v1158_v2, %v2592_v10  ;;  %vm1223_vm8 = vcmp.lt.f32.partialorder %v1159_v54, %v2600_v42  ;;  %vm1226_vm9 = vcmp.lt.f32.partialorder %v1162_v6, %v2608_v1  ;;  %vm1227_vm10 = vcmp.lt.f32.partialorder %v1163_v47, %v2614_v5 }
 0x100   :  { %v2651_v50 = vpop.f32.mrf.mxu0  ;;  %vm1221_vm2 = vcmp.lt.f32.partialorder %v1157_v11, %v2606_v58  ;;  %vm1225_vm4 = vcmp.lt.f32.partialorder %v1161_v26, %v529_v34  ;;  %v2687_v34 = vpop.f32.mrf.mxu1  ;;  %v1164_v54 = vadd.f32 %v2649_v49, %v2506_v60  ;;  %v1167_v60 = vadd.f32 %v2649_v49, %v2508_v63  ;;  %p1998_p3 = por %p1997_p2, %p1996_p1 }
 0x101   :  { %v1356_v30 = vpop.permute.xlu0 %1355  ;;  %v1359_v57 = vpop.permute.xlu1 %1358  ;;  %v1541_v52 = vsel %vm1221_vm2, %v1353_v38, 512  ;;  %v1169_v63 = vadd.f32 %v2649_v49, %v2512_v3  ;;  %v1171_v3 = vadd.f32 %v2649_v49, %v2516_v8  ;;  %v1173_v8 = vadd.f32 %v2649_v49, %v2520_v12 }
 0x102   :  { %v2657_v61 = vpop.f32.mrf.mxu0  ;;  %v1542_v56 = vsel %vm1222_vm7, %v1356_v30, 512  ;;  %v1543_v35 = vsel %vm1223_vm8, %v1359_v57, 512  ;;  %vm1228_vm13 = vcmp.lt.f32.partialorder %v1164_v54, %v2628_v19  ;;  %v2699_v30 = vpop.f32.mrf.mxu1  ;;  %vm1231_vm2 = vcmp.lt.f32.partialorder %v1167_v60, %v2630_v39  ;;  %p1999_p4 = pnand %p1998_p3, %p1992_p0 }
 0x103   :  { %v1175_v12 = vadd.f32 %v2649_v49, %v2524_v16  ;;  %v1177_v16 = vadd.f32 %v2649_v49, %v2528_v20 }
 0x104   :  { %v2670_v44 = vpop.f32.mrf.mxu0  ;;  %v2711_v6 = vpop.f32.mrf.mxu1 }
 0x105   :  { %v1362_v53 = vpop.permute.xlu0 %1361  ;;  %v1365_v51 = vpop.permute.xlu1 %1364 }
 0x106   :  { %v2675_v23 = vpop.f32.mrf.mxu0  ;;  %v1544_v43 = vsel %vm1224_vm3, %v1362_v53, 512  ;;  %v1545_v46 = vsel %vm1225_vm4, %v1365_v51, 512  ;;  %v1166_v51 = vadd.f32 %v2649_v49, %v2510_v0  ;;  %v1168_v0 = vadd.f32 %v2649_v49, %v2514_v4 }
 0x107   :  { %vm1604_vm5 = vcmp.lt.s32.totalorder %v1540_v48, %v1544_v43  ;;  %vm1606_vm6 = vcmp.lt.s32.totalorder %v1541_v52, %v1545_v46  ;;  %v1170_v4 = vadd.f32 %v2649_v49, %v2518_v9  ;;  %v1172_v9 = vadd.f32 %v2649_v49, %v2522_v13 }
 0x108   :  { %v2681_v27 = vpop.f32.mrf.mxu0  ;;  %v1605_v58 = vsel %vm1604_vm5, %v1540_v48, %v1544_v43  ;;  %v1607_v18 = vsel %vm1606_vm6, %v1541_v52, %v1545_v46  ;;  %v1165_v46 = vadd.f32 %v2649_v49, %v2504_v59  ;;  %vm1230_vm1 = vcmp.lt.f32.partialorder %v1166_v51, %v2620_v31 }
 0x109   :  { %v1368_v55 = vpop.permute.xlu0 %1367  ;;  %v1371_v53 = vpop.permute.xlu1 %1370  ;;  %vm1232_vm5 = vcmp.lt.f32.partialorder %v1168_v0, %v2644_v7  ;;  %vm1233_vm6 = vcmp.lt.f32.partialorder %v1169_v63, %v2657_v61  ;;  %v1174_v13 = vadd.f32 %v2649_v49, %v2526_v17  ;;  %v1176_v17 = vadd.f32 %v2649_v49, %v2530_v21 }
 0x10a   :  { %v2689_v38 = vpop.f32.mrf.mxu0  ;;  %v1546_v11 = vsel %vm1226_vm9, %v1368_v55, 512  ;;  %v1547_v26 = vsel %vm1227_vm10, %v1371_v53, 512  ;;  %vm1229_vm14 = vcmp.lt.f32.partialorder %v1165_v46, %v2638_v22  ;;  %vm1234_vm9 = vcmp.lt.f32.partialorder %v1170_v4, %v2640_v15 }
 0x10b   :  { %vm1608_vm11 = vcmp.lt.s32.totalorder %v1542_v56, %v1546_v11  ;;  %vm1610_vm12 = vcmp.lt.s32.totalorder %v1543_v35, %v1547_v26  ;;  %vm1235_vm10 = vcmp.lt.f32.partialorder %v1171_v3, %v2651_v50 }
 0x10c   :  { %v2695_v1 = vpop.f32.mrf.mxu0  ;;  %v1609_v10 = vsel %vm1608_vm11, %v1542_v56, %v1546_v11  ;;  %v1611_v42 = vsel %vm1610_vm12, %v1543_v35, %v1547_v26  ;;  %v2721_v56 = vpop.f32.mrf.mxu1 }
 0x10d   :  { %v1374_v5 = vpop.permute.xlu0 %1373  ;;  %v1377_v2 = vpop.permute.xlu1 %1376 }
 0x10e   :  { %v2701_v57 = vpop.f32.mrf.mxu0  ;;  %v1548_v59 = vsel %vm1228_vm13, %v1374_v5, 512  ;;  %v1549_v48 = vsel %vm1229_vm14, %v1377_v2, 512  ;;  %vm1236_vm13 = vcmp.lt.f32.partialorder %v1172_v9, %v2675_v23  ;;  %vm1237_vm14 = vcmp.lt.f32.partialorder %v1173_v8, %v2689_v38 }
 0x10f   :  { %vm1612_vm15 = vcmp.lt.s32.totalorder %v1605_v58, %v1548_v59  ;;  %vm1614_vm0 = vcmp.lt.s32.totalorder %v1607_v18, %v1549_v48  ;;  %v1180_v8 = vadd.f32 %v2649_v49, %v2538_v29 }
 0x110   :  { %v2707_v52 = vpop.f32.mrf.mxu0  ;;  %v1613_v19 = vsel %vm1612_vm15, %v1605_v58, %v1548_v59  ;;  %v1615_v22 = vsel %vm1614_vm0, %v1607_v18, %v1549_v48 }
 0x111   :  { %v1380_v43 = vpop.permute.xlu0 %1379  ;;  %v1383_v47 = vpop.permute.xlu1 %1382 }
 0x112   :  { %v1550_v14 = vsel %vm1230_vm1, %v1380_v43, 512  ;;  %v1551_v55 = vsel %vm1231_vm2, %v1383_v47, 512  ;;  %v2717_v58 = vpop.f32.mrf.mxu0  ;;  %vm1238_vm1 = vcmp.lt.f32.partialorder %v1174_v13, %v2670_v44  ;;  %vm1239_vm2 = vcmp.lt.f32.partialorder %v1175_v12, %v2681_v27 }
 0x113   :  { %vm1616_vm3 = vcmp.lt.s32.totalorder %v1609_v10, %v1550_v14  ;;  %vm1618_vm4 = vcmp.lt.s32.totalorder %v1611_v42, %v1551_v55 }
 0x114   :  { %v1617_v18 = vsel %vm1616_vm3, %v1609_v10, %v1550_v14  ;;  %v1619_v31 = vsel %vm1618_vm4, %v1611_v42, %v1551_v55  ;;  %v2727_v26 = vpop.f32.mrf.mxu0  ;;  %v2731_v10 = vpop.f32.mrf.mxu1 }
 0x115   :  { %v1386_v39 = vpop.permute.xlu0 %1385  ;;  %v1389_v53 = vpop.permute.xlu1 %1388 }
 0x116   :  { %v1552_v35 = vsel %vm1232_vm5, %v1386_v39, 512  ;;  %v1553_v11 = vsel %vm1233_vm6, %v1389_v53, 512  ;;  %v2737_v2 = vpop.f32.mrf.mxu0  ;;  %v2741_v60 = vpop.f32.mrf.mxu1  ;;  %vm1240_vm5 = vcmp.lt.f32.partialorder %v1176_v17, %v2701_v57  ;;  %vm1241_vm6 = vcmp.lt.f32.partialorder %v1177_v16, %v2717_v58 }
 0x117   :  { %vm1620_vm7 = vcmp.lt.s32.totalorder %v1613_v19, %v1552_v35  ;;  %vm1622_vm8 = vcmp.lt.s32.totalorder %v1615_v22, %v1553_v11  ;;  %v1179_v57 = vadd.f32 %v2649_v49, %v2532_v24  ;;  %v1178_v58 = vadd.f32 %v2649_v49, %v2534_v25 }
 0x118   :  { %v1621_v46 = vsel %vm1620_vm7, %v1613_v19, %v1552_v35  ;;  %v1623_v7 = vsel %vm1622_vm8, %v1615_v22, %v1553_v11  ;;  %v1893_v22 = vpop.f32.mrf.mxu0  ;;  %v2749_v14 = vpop.f32.mrf.mxu1  ;;  %v1183_v24 = vadd.f32 %v2649_v49, %v2540_v32  ;;  %v1182_v25 = vadd.f32 %v2649_v49, %v2542_v33 }
 0x119   :  { %v1392_v61 = vpop.permute.xlu0 %1391  ;;  %v1395_v54 = vpop.permute.xlu1 %1394 }
 0x11a   :  { %v1554_v42 = vsel %vm1234_vm9, %v1392_v61, 512  ;;  %v1555_v5 = vsel %vm1235_vm10, %v1395_v54, 512  ;;  %v609_v0 = vpop.f32.mrf.mxu0  ;;  %v2757_v39 = vpop.f32.mrf.mxu1  ;;  %vm1242_vm9 = vcmp.lt.f32.partialorder %v1178_v58, %v2695_v1  ;;  %vm1243_vm10 = vcmp.lt.f32.partialorder %v1179_v57, %v2707_v52  ;;  %v2960_v58 = vld [vmem:[#allocation9_spill] sm:$0xff] }
 0x11b   :  { %vm1624_vm11 = vcmp.lt.s32.totalorder %v1617_v18, %v1554_v42  ;;  %vm1626_vm12 = vcmp.lt.s32.totalorder %v1619_v31, %v1555_v5  ;;  %v1185_v52 = vadd.f32 %v2649_v49, %v2544_v36  ;;  %v1189_v36 = vadd.f32 %v2649_v49, %v2552_v45 }
 0x11c   :  { %v1625_v59 = vsel %vm1624_vm11, %v1617_v18, %v1554_v42  ;;  %v1627_v15 = vsel %vm1626_vm12, %v1619_v31, %v1555_v5  ;;  %v2759_v20 = vpop.f32.mrf.mxu0  ;;  %v1181_v5 = vadd.f32 %v2649_v49, %v2536_v28  ;;  %vm1246_vm11 = vcmp.lt.f32.partialorder %v1182_v25, %v2727_v26  ;;  %v2962_v25 = vld [vmem:[#allocation37_spill] sm:$0xff] }
 0x11d   :  { %v1398_v50 = vpop.permute.xlu0 %1397  ;;  %v1401_v48 = vpop.permute.xlu1 %1400  ;;  %vm1244_vm12 = vcmp.lt.f32.partialorder %v1180_v8, %v2737_v2  ;;  %v1187_v26 = vadd.f32 %v2649_v49, %v2548_v40  ;;  %v1186_v2 = vadd.f32 %v2649_v49, %v2550_v41 }
 0x11e   :  { %v1556_v51 = vsel %vm1236_vm13, %v1398_v50, 512  ;;  %v1557_v19 = vsel %vm1237_vm14, %v1401_v48, 512  ;;  %vm1247_vm13 = vcmp.lt.f32.partialorder %v1183_v24, %v1893_v22  ;;  %vm1245_vm14 = vcmp.lt.f32.partialorder %v1181_v5, %v609_v0 }
 0x11f   :  { %vm1628_vm15 = vcmp.lt.s32.totalorder %v1621_v46, %v1556_v51  ;;  %vm1630_vm0 = vcmp.lt.s32.totalorder %v1623_v7, %v1557_v19 }
 0x120   :  { %v1629_v43 = vsel %vm1628_vm15, %v1621_v46, %v1556_v51  ;;  %v1631_v47 = vsel %vm1630_vm0, %v1623_v7, %v1557_v19  ;;  %v2761_v46 = vpop.f32.mrf.mxu1  ;;  %v622_v7 = vpop.f32.mrf.mxu0  ;;  %v1184_v19 = vadd.f32 %v2649_v49, %v2546_v37  ;;  %v2957_v37 = vld [vmem:[#allocation8_spill] sm:$0xff] }
 0x121   :  { %v1404_v23 = vpop.permute.xlu0 %1403  ;;  %v1407_v38 = vpop.permute.xlu1 %1406  ;;  %v1188_v40 = vadd.f32 %v2649_v49, %v2957_v37  ;;  %v2967_v37 = vld [vmem:[#allocation14_spill] sm:$0xff] }
 0x122   :  { %v1558_v55 = vsel %vm1238_vm1, %v1404_v23, 512  ;;  %v1559_v63 = vsel %vm1239_vm2, %v1407_v38, 512  ;;  %v2767_v42 = vpop.f32.mrf.mxu1  ;;  %v1897_v9 = vpop.f32.mrf.mxu0 }
 0x123   :  { %vm1632_vm3 = vcmp.lt.s32.totalorder %v1625_v59, %v1558_v55  ;;  %vm1634_vm4 = vcmp.lt.s32.totalorder %v1627_v15, %v1559_v63 }
 0x124   :  { %v1633_v18 = vsel %vm1632_vm3, %v1625_v59, %v1558_v55  ;;  %v1635_v31 = vsel %vm1634_vm4, %v1627_v15, %v1559_v63  ;;  %v2779_v51 = vpop.f32.mrf.mxu1  ;;  %v625_v32 = vpop.f32.mrf.mxu0  ;;  %vm1248_vm3 = vcmp.lt.f32.partialorder %v1184_v19, %v622_v7 }
 0x125   :  { %v1410_v44 = vpop.permute.xlu0 %1409  ;;  %v1413_v27 = vpop.permute.xlu1 %1412  ;;  %vm1249_vm4 = vcmp.lt.f32.partialorder %v1185_v52, %v625_v32 }
 0x126   :  { %v1560_v53 = vsel %vm1240_vm5, %v1410_v44, 512  ;;  %v1561_v35 = vsel %vm1241_vm6, %v1413_v27, 512  ;;  %v2791_v22 = vpop.f32.mrf.mxu1 }
 0x127   :  { %vm1636_vm7 = vcmp.lt.s32.totalorder %v1629_v43, %v1560_v53  ;;  %vm1638_vm8 = vcmp.lt.s32.totalorder %v1631_v47, %v1561_v35 }
 0x128   :  { %v1637_v21 = vsel %vm1636_vm7, %v1629_v43, %v1560_v53  ;;  %v1639_v11 = vsel %vm1638_vm8, %v1631_v47, %v1561_v35  ;;  %vm1250_vm7 = vcmp.lt.f32.partialorder %v1186_v2, %v2759_v20  ;;  %vm1251_vm8 = vcmp.lt.f32.partialorder %v1187_v26, %v1897_v9  ;;  %v2800_v17 = vpop.f32.mrf.mxu1  ;;  %v2958_v53 = vld [vmem:[#allocation40_spill] sm:$0xff]  ;;  %v2959_v35 = vld [vmem:[#allocation42_spill] sm:$0xff]  ;;  %v2963_v9 = vld [vmem:[#allocation41_spill] sm:$0xff] }
 0x129   :  { %v1416_v3 = vpop.permute.xlu0 %1415  ;;  %v1419_v4 = vpop.permute.xlu1 %1418 }
 0x12a   :  { %v1562_v59 = vsel %vm1242_vm9, %v1416_v3, 512  ;;  %v1563_v15 = vsel %vm1243_vm10, %v1419_v4, 512 }
 0x12b   :  { %vm1640_vm15 = vcmp.lt.s32.totalorder %v1633_v18, %v1562_v59  ;;  %vm1642_vm0 = vcmp.lt.s32.totalorder %v1635_v31, %v1563_v15 }
 0x12c   :  { %v1641_v43 = vsel %vm1640_vm15, %v1633_v18, %v1562_v59  ;;  %v1643_v47 = vsel %vm1642_vm0, %v1635_v31, %v1563_v15 }
 0x12d   :  { %v1422_v61 = vpop.permute.xlu0 %1421  ;;  %v1425_v54 = vpop.permute.xlu1 %1424 }
 0x12e   :  { %v1564_v28 = vsel %vm1244_vm12, %v1422_v61, 512  ;;  %v1565_v29 = vsel %vm1245_vm14, %v1425_v54, 512  ;;  %vm1253_vm14 = vcmp.lt.f32.partialorder %v1189_v36, %v2959_v35  ;;  %v1191_v61 = vadd.f32 %v2649_v49, %v2960_v58  ;;  %v2961_v54 = vld [vmem:[#allocation10_spill] sm:$0xff] }
 0x12f   :  { %vm1644_vm1 = vcmp.lt.s32.totalorder %v1637_v21, %v1564_v28  ;;  %vm1646_vm2 = vcmp.lt.s32.totalorder %v1639_v11, %v1565_v29  ;;  %v1190_v5 = vadd.f32 %v2649_v49, %v2961_v54 }
 0x130   :  { %v1645_v38 = vsel %vm1644_vm1, %v1637_v21, %v1564_v28  ;;  %v1647_v55 = vsel %vm1646_vm2, %v1639_v11, %v1565_v29  ;;  %v2804_v11 = vpop.f32.mrf.mxu1  ;;  %vm1255_vm2 = vcmp.lt.f32.partialorder %v1191_v61, %v2963_v9  ;;  %v2964_v29 = vld [vmem:[#allocation11_spill] sm:$0xff] }
 0x131   :  { %v1428_v50 = vpop.permute.xlu0 %1427  ;;  %v1431_v48 = vpop.permute.xlu1 %1430  ;;  %vm1254_vm1 = vcmp.lt.f32.partialorder %v1190_v5, %v2962_v25  ;;  %v1193_v32 = vadd.f32 %v2649_v49, %v2964_v29  ;;  %v2972_v5 = vld [vmem:[#allocation19_spill] sm:$0xff]  ;;  %v2974_v29 = vld [vmem:[#allocation21_spill] sm:$0xff] }
 0x132   :  { %v1566_v1 = vsel %vm1246_vm11, %v1428_v50, 512  ;;  %v1567_v33 = vsel %vm1247_vm13, %v1431_v48, 512  ;;  %vm1252_vm13 = vcmp.lt.f32.partialorder %v1188_v40, %v2958_v53  ;;  %v2812_v50 = vpop.f32.mrf.mxu1  ;;  %v1194_v40 = vadd.f32 %v2649_v49, %v2967_v37 }
 0x133   :  { %vm1648_vm5 = vcmp.lt.s32.totalorder %v1641_v43, %v1566_v1  ;;  %vm1650_vm6 = vcmp.lt.s32.totalorder %v1643_v47, %v1567_v33 }
 0x134   :  { %v1649_v0 = vsel %vm1648_vm5, %v1641_v43, %v1566_v1  ;;  %v1651_v31 = vsel %vm1650_vm6, %v1643_v47, %v1567_v33  ;;  %v2965_v1 = vld [vmem:[#allocation12_spill] sm:$0xff]  ;;  %vm1257_vm6 = vcmp.lt.f32.partialorder %v1193_v32, %v2711_v6  ;;  %v2966_v47 = vld [vmem:[#allocation13_spill] sm:$0xff]  ;;  %v1203_v32 = vadd.f32 %v2649_v49, %v2974_v29 }
 0x135   :  { %v1434_v12 = vpop.permute.xlu0 %1433  ;;  %v1437_v13 = vpop.permute.xlu1 %1436  ;;  %v1192_v33 = vadd.f32 %v2649_v49, %v2965_v1  ;;  %v1195_v36 = vadd.f32 %v2649_v49, %v2966_v47  ;;  %v2975_v1 = vld [vmem:[#allocation22_spill] sm:$0xff] }
 0x136   :  { %v1568_v41 = vsel %vm1248_vm3, %v1434_v12, 512  ;;  %v1569_v23 = vsel %vm1249_vm4, %v1437_v13, 512  ;;  %v2820_v12 = vpop.f32.mrf.mxu1 }
 0x137   :  { %vm1652_vm9 = vcmp.lt.s32.totalorder %v1645_v38, %v1568_v41  ;;  %vm1654_vm10 = vcmp.lt.s32.totalorder %v1647_v55, %v1569_v23  ;;  %vm1256_vm5 = vcmp.lt.f32.partialorder %v1192_v33, %v2687_v34  ;;  %v1202_v33 = vadd.f32 %v2649_v49, %v2975_v1 }
 0x138   :  { %v1653_v3 = vsel %vm1652_vm9, %v1645_v38, %v1568_v41  ;;  %v1655_v7 = vsel %vm1654_vm10, %v1647_v55, %v1569_v23  ;;  %vm1258_vm9 = vcmp.lt.f32.partialorder %v1194_v40, %v2673_v62  ;;  %vm1259_vm10 = vcmp.lt.f32.partialorder %v1195_v36, %v2699_v30  ;;  %v2828_v38 = vpop.f32.mrf.mxu1  ;;  %v2977_v36 = vld [vmem:[#allocation24_spill] sm:$0xff] }
 0x139   :  { %v1440_v63 = vpop.permute.xlu0 %1439  ;;  %v1443_v16 = vpop.permute.xlu1 %1442  ;;  %v1204_v37 = vadd.f32 %v2649_v49, %v2977_v36 }
 0x13a   :  { %v1570_v18 = vsel %vm1250_vm7, %v1440_v63, 512  ;;  %v1571_v44 = vsel %vm1251_vm8, %v1443_v16, 512  ;;  %v2968_v16 = vld [vmem:[#allocation15_spill] sm:$0xff] }
 0x13b   :  { %vm1656_vm11 = vcmp.lt.s32.totalorder %v1649_v0, %v1570_v18  ;;  %vm1658_vm12 = vcmp.lt.s32.totalorder %v1651_v31, %v1571_v44 }
 0x13c   :  { %v1657_v45 = vsel %vm1656_vm11, %v1649_v0, %v1570_v18  ;;  %v1659_v27 = vsel %vm1658_vm12, %v1651_v31, %v1571_v44  ;;  %v1197_v0 = vadd.f32 %v2649_v49, %v2968_v16  ;;  %v2969_v18 = vld [vmem:[#allocation16_spill] sm:$0xff]  ;;  %v2979_v16 = vld [vmem:[#allocation26_spill] sm:$0xff] }
 0x13d   :  { %v1446_v20 = vpop.permute.xlu0 %1445  ;;  %v1449_v21 = vpop.permute.xlu1 %1448  ;;  %v1196_v31 = vadd.f32 %v2649_v49, %v2969_v18 }
 0x13e   :  { %v1572_v4 = vsel %vm1252_vm13, %v1446_v20, 512  ;;  %v1573_v57 = vsel %vm1253_vm14, %v1449_v21, 512  ;;  %vm1261_vm14 = vcmp.lt.f32.partialorder %v1197_v0, %v2749_v14  ;;  %v2970_v20 = vld [vmem:[#allocation17_spill] sm:$0xff]  ;;  %v1206_v0 = vadd.f32 %v2649_v49, %v2979_v16  ;;  %v2990_v16 = vld [vmem:[#allocation38_spill] sm:$0xff] }
 0x13f   :  { %vm1660_vm15 = vcmp.lt.s32.totalorder %v1653_v3, %v1572_v4  ;;  %vm1662_vm0 = vcmp.lt.s32.totalorder %v1655_v7, %v1573_v57  ;;  %vm1260_vm13 = vcmp.lt.f32.partialorder %v1196_v31, %v2731_v10  ;;  %v1199_v21 = vadd.f32 %v2649_v49, %v2970_v20 }
 0x140   :  { %v1661_v8 = vsel %vm1660_vm15, %v1653_v3, %v1572_v4  ;;  %v1663_v24 = vsel %vm1662_vm0, %v1655_v7, %v1573_v57  ;;  %v2971_v3 = vld [vmem:[#allocation18_spill] sm:$0xff] }
 0x141   :  { %v1452_v59 = vpop.permute.xlu0 %1451  ;;  %v1455_v15 = vpop.permute.xlu1 %1454  ;;  %v1198_v4 = vadd.f32 %v2649_v49, %v2971_v3 }
 0x142   :  { %v1574_v48 = vsel %vm1254_vm1, %v1452_v59, 512  ;;  %v1575_v28 = vsel %vm1255_vm2, %v1455_v15, 512  ;;  %vm1263_vm2 = vcmp.lt.f32.partialorder %v1199_v21, %v2741_v60 }
 0x143   :  { %vm1664_vm3 = vcmp.lt.s32.totalorder %v1657_v45, %v1574_v48  ;;  %vm1666_vm4 = vcmp.lt.s32.totalorder %v1659_v27, %v1575_v28  ;;  %vm1262_vm1 = vcmp.lt.f32.partialorder %v1198_v4, %v2721_v56 }
 0x144   :  { %v1665_v52 = vsel %vm1664_vm3, %v1657_v45, %v1574_v48  ;;  %v1667_v19 = vsel %vm1666_vm4, %v1659_v27, %v1575_v28  ;;  %v2836_v27 = vpop.f32.mrf.mxu1 }
 0x145   :  { %v1458_v26 = vpop.permute.xlu0 %1457  ;;  %v1461_v2 = vpop.permute.xlu1 %1460 }
 0x146   :  { %v1576_v13 = vsel %vm1256_vm5, %v1458_v26, 512  ;;  %v1577_v43 = vsel %vm1257_vm6, %v1461_v2, 512  ;;  %v2844_v58 = vpop.f32.mrf.mxu1 }
 0x147   :  { %vm1668_vm7 = vcmp.lt.s32.totalorder %v1661_v8, %v1576_v13  ;;  %vm1670_vm8 = vcmp.lt.s32.totalorder %v1663_v24, %v1577_v43 }
 0x148   :  { %v1669_v41 = vsel %vm1668_vm7, %v1661_v8, %v1576_v13  ;;  %v1671_v23 = vsel %vm1670_vm8, %v1663_v24, %v1577_v43  ;;  %v1201_v8 = vadd.f32 %v2649_v49, %v2972_v5  ;;  %v2973_v24 = vld [vmem:[#allocation20_spill] sm:$0xff]  ;;  %v2852_v15 = vpop.f32.mrf.mxu1  ;;  %v2976_v43 = vld [vmem:[#allocation23_spill] sm:$0xff] }
 0x149   :  { %v1464_v34 = vpop.permute.xlu0 %1463  ;;  %v1467_v6 = vpop.permute.xlu1 %1466  ;;  %v1200_v25 = vadd.f32 %v2649_v49, %v2973_v24  ;;  %v1205_v47 = vadd.f32 %v2649_v49, %v2976_v43 }
 0x14a   :  { %v1578_v55 = vsel %vm1258_vm9, %v1464_v34, 512  ;;  %v1579_v63 = vsel %vm1259_vm10, %v1467_v6, 512  ;;  %vm1265_vm6 = vcmp.lt.f32.partialorder %v1201_v8, %v2779_v51  ;;  %vm1266_vm9 = vcmp.lt.f32.partialorder %v1202_v33, %v2757_v39  ;;  %v2860_v26 = vpop.f32.mrf.mxu1 }
 0x14b   :  { %vm1672_vm11 = vcmp.lt.s32.totalorder %v1665_v52, %v1578_v55  ;;  %vm1674_vm12 = vcmp.lt.s32.totalorder %v1667_v19, %v1579_v63  ;;  %vm1264_vm5 = vcmp.lt.f32.partialorder %v1200_v25, %v2761_v46  ;;  %vm1267_vm10 = vcmp.lt.f32.partialorder %v1203_v32, %v2767_v42 }
 0x14c   :  { %v1673_v44 = vsel %vm1672_vm11, %v1665_v52, %v1578_v55  ;;  %v1675_v45 = vsel %vm1674_vm12, %v1667_v19, %v1579_v63  ;;  %v2978_v55 = vld [vmem:[#allocation25_spill] sm:$0xff] }
 0x14d   :  { %v1470_v62 = vpop.permute.xlu0 %1469  ;;  %v1473_v30 = vpop.permute.xlu1 %1472  ;;  %v1207_v63 = vadd.f32 %v2649_v49, %v2978_v55 }
 0x14e   :  { %v1580_v53 = vsel %vm1260_vm13, %v1470_v62, 512  ;;  %v1581_v35 = vsel %vm1261_vm14, %v1473_v30, 512  ;;  %vm1268_vm13 = vcmp.lt.f32.partialorder %v1204_v37, %v2800_v17  ;;  %vm1269_vm14 = vcmp.lt.f32.partialorder %v1205_v47, %v2812_v50  ;;  %v2980_v30 = vld [vmem:[#allocation27_spill] sm:$0xff] }
 0x14f   :  { %vm1676_vm15 = vcmp.lt.s32.totalorder %v1669_v41, %v1580_v53  ;;  %vm1678_vm0 = vcmp.lt.s32.totalorder %v1671_v23, %v1581_v35 }
 0x150   :  { %v1677_v7 = vsel %vm1676_vm15, %v1669_v41, %v1580_v53  ;;  %v1679_v57 = vsel %vm1678_vm0, %v1671_v23, %v1581_v35  ;;  %v2868_v23 = vpop.f32.mrf.mxu1  ;;  %v1209_v53 = vadd.f32 %v2649_v49, %v2980_v30  ;;  %v2981_v35 = vld [vmem:[#allocation28_spill] sm:$0xff] }
 0x151   :  { %v1476_v10 = vpop.permute.xlu0 %1475  ;;  %v1479_v14 = vpop.permute.xlu1 %1478  ;;  %v1208_v20 = vadd.f32 %v2649_v49, %v2981_v35 }
 0x152   :  { %v1582_v61 = vsel %vm1262_vm1, %v1476_v10, 512  ;;  %v1583_v54 = vsel %vm1263_vm2, %v1479_v14, 512  ;;  %vm1270_vm1 = vcmp.lt.f32.partialorder %v1206_v0, %v2791_v22  ;;  %vm1271_vm2 = vcmp.lt.f32.partialorder %v1207_v63, %v2804_v11  ;;  %v2982_v10 = vld [vmem:[#allocation29_spill] sm:$0xff] }
 0x153   :  { %vm1680_vm3 = vcmp.lt.s32.totalorder %v1673_v44, %v1582_v61  ;;  %vm1682_vm4 = vcmp.lt.s32.totalorder %v1675_v45, %v1583_v54  ;;  %v1211_v14 = vadd.f32 %v2649_v49, %v2982_v10  ;;  %v1219_v0 = vadd.f32 %v2649_v49, %v2990_v16 }
 0x154   :  { %v1681_v9 = vsel %vm1680_vm3, %v1673_v44, %v1582_v61  ;;  %v1683_v59 = vsel %vm1682_vm4, %v1675_v45, %v1583_v54  ;;  %v737_v44 = vpop.f32.mrf.mxu1  ;;  %v2983_v61 = vld [vmem:[#allocation30_spill] sm:$0xff] }
 0x155   :  { %v1482_v56 = vpop.permute.xlu0 %1481  ;;  %v1485_v60 = vpop.permute.xlu1 %1484  ;;  %v1210_v54 = vadd.f32 %v2649_v49, %v2983_v61  ;;  %v1752_v61 = vstv %s2916_s0 }
 0x156   :  { %v1584_v48 = vsel %vm1264_vm5, %v1482_v56, 512  ;;  %v1585_v28 = vsel %vm1265_vm6, %v1485_v60, 512  ;;  %vm1272_vm5 = vcmp.lt.f32.partialorder %v1208_v20, %v2828_v38  ;;  %vm1273_vm6 = vcmp.lt.f32.partialorder %v1209_v53, %v2844_v58  ;;  %v2882_v4 = vpop.f32.mrf.mxu1  ;;  %v2985_v60 = vld [vmem:[#allocation32_spill] sm:$0xff] }
 0x157   :  { %vm1684_vm7 = vcmp.lt.s32.totalorder %v1677_v7, %v1584_v48  ;;  %vm1686_vm8 = vcmp.lt.s32.totalorder %v1679_v57, %v1585_v28 }
 0x158   :  { %v1685_v52 = vsel %vm1684_vm7, %v1677_v7, %v1584_v48  ;;  %v1687_v19 = vsel %vm1686_vm8, %v1679_v57, %v1585_v28  ;;  %v750_v24 = vpop.f32.mrf.mxu1  ;;  %v1212_v48 = vadd.f32 %v2649_v49, %v2985_v60 }
 0x159   :  { %v1488_v46 = vpop.permute.xlu0 %1487  ;;  %v1491_v51 = vpop.permute.xlu1 %1490 }
 0x15a   :  { %v1586_v2 = vsel %vm1266_vm9, %v1488_v46, 512  ;;  %v1587_v13 = vsel %vm1267_vm10, %v1491_v51, 512  ;;  %vm1274_vm9 = vcmp.lt.f32.partialorder %v1210_v54, %v2820_v12  ;;  %vm1275_vm10 = vcmp.lt.f32.partialorder %v1211_v14, %v2836_v27  ;;  %v1929_v32 = vpop.f32.mrf.mxu1  ;;  %v2987_v46 = vld [vmem:[#allocation34_spill] sm:$0xff] }
 0x15b   :  { %vm1688_vm11 = vcmp.lt.s32.totalorder %v1681_v9, %v1586_v2  ;;  %vm1690_vm12 = vcmp.lt.s32.totalorder %v1683_v59, %v1587_v13  ;;  %v1214_v51 = vadd.f32 %v2649_v49, %v2987_v46 }
 0x15c   :  { %v1689_v40 = vsel %vm1688_vm11, %v1681_v9, %v1586_v2  ;;  %v1691_v41 = vsel %vm1690_vm12, %v1683_v59, %v1587_v13  ;;  %v2984_v59 = vld [vmem:[#allocation31_spill] sm:$0xff]  ;;  %v753_v47 = vpop.f32.mrf.mxu1 }
 0x15d   :  { %v1494_v39 = vpop.permute.xlu0 %1493  ;;  %v1497_v42 = vpop.permute.xlu1 %1496  ;;  %v1213_v56 = vadd.f32 %v2649_v49, %v2984_v59 }
 0x15e   :  { %v1588_v34 = vsel %vm1268_vm13, %v1494_v39, 512  ;;  %v1589_v6 = vsel %vm1269_vm14, %v1497_v42, 512  ;;  %vm1276_vm13 = vcmp.lt.f32.partialorder %v1212_v48, %v2860_v26  ;;  %v2989_v39 = vld [vmem:[#allocation36_spill] sm:$0xff] }
 0x15f   :  { %vm1692_vm15 = vcmp.lt.s32.totalorder %v1685_v52, %v1588_v34  ;;  %vm1694_vm0 = vcmp.lt.s32.totalorder %v1687_v19, %v1589_v6  ;;  %vm1277_vm14 = vcmp.lt.f32.partialorder %v1213_v56, %v737_v44  ;;  %v1216_v42 = vadd.f32 %v2649_v49, %v2989_v39 }
 0x160   :  { %v1693_v18 = vsel %vm1692_vm15, %v1685_v52, %v1588_v34  ;;  %v1695_v31 = vsel %vm1694_vm0, %v1687_v19, %v1589_v6  ;;  %v2986_v52 = vld [vmem:[#allocation33_spill] sm:$0xff] }
 0x161   :  { %v1500_v17 = vpop.permute.xlu0 %1499  ;;  %v1503_v50 = vpop.permute.xlu1 %1502  ;;  %v1215_v19 = vadd.f32 %v2649_v49, %v2986_v52 }
 0x162   :  { %v1590_v45 = vsel %vm1270_vm1, %v1500_v17, 512  ;;  %v1591_v62 = vsel %vm1271_vm2, %v1503_v50, 512  ;;  %vm1278_vm1 = vcmp.lt.f32.partialorder %v1214_v51, %v2852_v15 }
 0x163   :  { %vm1696_vm3 = vcmp.lt.s32.totalorder %v1689_v40, %v1590_v45  ;;  %vm1698_vm4 = vcmp.lt.s32.totalorder %v1691_v41, %v1591_v62  ;;  %vm1279_vm2 = vcmp.lt.f32.partialorder %v1215_v19, %v2868_v23 }
 0x164   :  { %v1697_v21 = vsel %vm1696_vm3, %v1689_v40, %v1590_v45  ;;  %v1699_v3 = vsel %vm1698_vm4, %v1691_v41, %v1591_v62  ;;  %v2988_v40 = vld [vmem:[#allocation35_spill] sm:$0xff] }
 0x165   :  { %v1506_v22 = vpop.permute.xlu0 %1505  ;;  %v1509_v11 = vpop.permute.xlu1 %1508  ;;  %v1217_v41 = vadd.f32 %v2649_v49, %v2988_v40 }
 0x166   :  { %v1592_v7 = vsel %vm1272_vm5, %v1506_v22, 512  ;;  %v1593_v57 = vsel %vm1273_vm6, %v1509_v11, 512  ;;  %vm1280_vm5 = vcmp.lt.f32.partialorder %v1216_v42, %v750_v24 }
 0x167   :  { %vm1700_vm7 = vcmp.lt.s32.totalorder %v1693_v18, %v1592_v7  ;;  %vm1702_vm8 = vcmp.lt.s32.totalorder %v1695_v31, %v1593_v57  ;;  %vm1281_vm6 = vcmp.lt.f32.partialorder %v1217_v41, %v753_v47 }
 0x168   :  { %v1701_v5 = vsel %vm1700_vm7, %v1693_v18, %v1592_v7  ;;  %v1703_v8 = vsel %vm1702_vm8, %v1695_v31, %v1593_v57  ;;  %v2991_v18 = vld [vmem:[#allocation39_spill] sm:$0xff] }
 0x169   :  { %v1512_v38 = vpop.permute.xlu0 %1511  ;;  %v1515_v58 = vpop.permute.xlu1 %1514  ;;  %v1218_v31 = vadd.f32 %v2649_v49, %v2991_v18  ;;  %v1739_v57 = vld [vmem:[#allocation5] sm:$0x1] }
 0x16a   :  { %v1594_v25 = vsel %vm1274_vm9, %v1512_v38, 512  ;;  %v1595_v9 = vsel %vm1275_vm10, %v1515_v58, 512  ;;  %vm1283_vm10 = vcmp.lt.f32.partialorder %v1219_v0, %v1929_v32 }
 0x16b   :  { %vm1704_vm11 = vcmp.lt.s32.totalorder %v1697_v21, %v1594_v25  ;;  %vm1706_vm12 = vcmp.lt.s32.totalorder %v1699_v3, %v1595_v9  ;;  %vm1282_vm9 = vcmp.lt.f32.partialorder %v1218_v31, %v2882_v4 }
 0x16c   :  { %v1705_v28 = vsel %vm1704_vm11, %v1697_v21, %v1594_v25  ;;  %v1707_v29 = vsel %vm1706_vm12, %v1699_v3, %v1595_v9 }
 0x16d   :  { %v1518_v12 = vpop.permute.xlu0 %1517  ;;  %v1521_v27 = vpop.permute.xlu1 %1520 }
 0x16e   :  { %v1596_v1 = vsel %vm1276_vm13, %v1518_v12, 512  ;;  %v1597_v33 = vsel %vm1277_vm14, %v1521_v27, 512 }
 0x16f   :  { %vm1708_vm15 = vcmp.lt.s32.totalorder %v1701_v5, %v1596_v1  ;;  %vm1710_vm0 = vcmp.lt.s32.totalorder %v1703_v8, %v1597_v33 }
 0x170   :  { %v1709_v2 = vsel %vm1708_vm15, %v1701_v5, %v1596_v1  ;;  %v1711_v13 = vsel %vm1710_vm0, %v1703_v8, %v1597_v33 }
 0x171   :  { %v1524_v26 = vpop.permute.xlu0 %1523  ;;  %v1527_v43 = vpop.permute.xlu1 %1526 }
 0x172   :  { %v1598_v36 = vsel %vm1278_vm1, %v1524_v26, 512  ;;  %v1599_v37 = vsel %vm1279_vm2, %v1527_v43, 512 }
 0x173   :  { %vm1712_vm3 = vcmp.lt.s32.totalorder %v1705_v28, %v1598_v36  ;;  %vm1714_vm4 = vcmp.lt.s32.totalorder %v1707_v29, %v1599_v37 }
 0x174   :  { %v1713_v34 = vsel %vm1712_vm3, %v1705_v28, %v1598_v36  ;;  %v1715_v6 = vsel %vm1714_vm4, %v1707_v29, %v1599_v37 }
 0x175   :  { %v1530_v15 = vpop.permute.xlu0 %1529  ;;  %v1533_v55 = vpop.permute.xlu1 %1532 }
 0x176   :  { %v1600_v23 = vsel %vm1280_vm5, %v1530_v15, 512  ;;  %v1601_v63 = vsel %vm1281_vm6, %v1533_v55, 512 }
 0x177   :  { %vm1716_vm7 = vcmp.lt.s32.totalorder %v1709_v2, %v1600_v23  ;;  %vm1718_vm8 = vcmp.lt.s32.totalorder %v1711_v13, %v1601_v63 }
 0x178   :  { %v1717_v17 = vsel %vm1716_vm7, %v1709_v2, %v1600_v23  ;;  %v1719_v50 = vsel %vm1718_vm8, %v1711_v13, %v1601_v63 }
 0x179   :  { %vm1724_vm11 = vcmp.lt.s32.totalorder %v1717_v17, %v1719_v50  ;;  %v1536_v44 = vpop.permute.xlu0 %1535  ;;  %v1539_v45 = vpop.permute.xlu1 %1538 }
 0x17a   :  { %v1725_v62 = vsel %vm1724_vm11, %v1717_v17, %v1719_v50  ;;  %v1602_v30 = vsel %vm1282_vm9, %v1536_v44, 512  ;;  %v1603_v53 = vsel %vm1283_vm10, %v1539_v45, 512 }
 0x17b   :  { %vm1720_vm12 = vcmp.lt.s32.totalorder %v1713_v34, %v1602_v30  ;;  %vm1722_vm13 = vcmp.lt.s32.totalorder %v1715_v6, %v1603_v53 }
 0x17c   :  { %v1721_v35 = vsel %vm1720_vm12, %v1713_v34, %v1602_v30  ;;  %v1723_v20 = vsel %vm1722_vm13, %v1715_v6, %v1603_v53 }
 0x17d   :  { %vm1726_vm14 = vcmp.lt.s32.totalorder %v1721_v35, %v1723_v20 }
 0x17e   :  { %v1727_v21 = vsel %vm1726_vm14, %v1721_v35, %v1723_v20 }
 0x17f   :  { %vm1728_vm15 = vcmp.lt.s32.totalorder %v1725_v62, %v1727_v21 }
 0x180   :  { %v1729_v49 = vsel %vm1728_vm15, %v1725_v62, %v1727_v21 }
 0x181   :  { %v1730_v3 = vrot.slane %v1729_v49, 4 }
 0x183   :  { %vm1731_vm0 = vcmp.lt.s32.totalorder %v1729_v49, %v1730_v3 }
 0x184   :  { %v1732_v22 = vsel %vm1731_vm0, %v1729_v49, %v1730_v3 }
 0x185   :  { %v1733_v11 = vrot.slane %v1732_v22, 2 }
 0x187   :  { %vm1734_vm1 = vcmp.lt.s32.totalorder %v1732_v22, %v1733_v11 }
 0x188   :  { %v1735_v4 = vsel %vm1734_vm1, %v1732_v22, %v1733_v11 }
 0x189   :  { %v1736_v7 = vrot.slane %v1735_v4, 1 }
 0x18b   :  { %vm1737_vm2 = vcmp.lt.s32.totalorder %v1735_v4, %v1736_v7 }
 0x18c   :  { %v1738_v10 = vsel %vm1737_vm2, %v1735_v4, %v1736_v7 }
 0x18d   :  { %vm1743_vm3 = vcmp.lt.s32.totalorder %v1739_v57, %v1738_v10 }
 0x18e   :  { %v1744_v14 = vsel %vm1743_vm3, %v1739_v57, %v1738_v10 }
 0x18f   :  { %1745 = vst [vmem:[#allocation5] sm:$0x1] %v1744_v14 }
 0x196   :  { %v1749_v54 = vld [vmem:[#allocation5] sm:$0x1] }
 0x197   :  { %vm1750_vm4 = vcmp.lt.s32.totalorder %v1749_v54, 512 }
 0x198   :  { %v1753_v5 = vsel %vm1750_vm4, %v1749_v54, %v1752_v61 }
 0x199   :  { %1754 = vst [vmem:[#allocation5] sm:$0x1] %v1753_v5 }
 0x19a   :  { %2002 = shalt.err (!%p1999_p4)
}
 0x19b   :  { %1764 = dma.vmem_to_hbm [thread:$0]  %s1762_s19, 16, %s2921_s5, [#allocation6]  }
 0x19c   :  { %2011 = dma.done.wait [#allocation6], 16  }
 0x19d   :  { %2012 = vsyncadd [#allocation6], 4294967280 }
 0x19e   :  { %1768 = vsyncpa [#allocation6], 1 }

</bundles_post_ra>
